<compile_context>
chip_gen: v6e
topology: v6e:2x2x1
jax: 0.10.0
libtpu: 0.0.40
codegen_flags: <defaults>
</compile_context>

<pallas_src>
import numpy as np
import jax
import jax.numpy as jnp
from jax.experimental import pallas as pl
from jax.experimental.pallas import tpu as pltpu

T, B, I, H, O = 8, 2, 1, 16, 5   # seq_len, batch, input_size, hidden_size, out_features

GP = 128            # per-gate lane padding (one full vreg lane-width per gate)
G3 = 3 * GP         # 384: padded r | z | n gate axis
# Packed parameter block layout (rows x 384 lanes):
R_WIH, R_BIH, R_BHH, R_BFC = 0, 1, 2, 3
R_WHH = 8                 # rows   8:136 -> W_hh^T, per-gate lane blocks, 128 contraction rows
R_WFC = R_WHH + GP        # rows 136:264 -> fc1.weight^T (lanes 0:O), 128 contraction rows
PR = R_WFC + GP           # 264 total rows (multiple of 8)


def gru_fc_kernel(x_sm, p_ref, out_ref, hall_ref):
    """Full GRU recurrence (only the live batch element) + final Linear.

    x_sm:     (T,)       input sequence for batch element B-1 (SMEM, scalar prefetch)
    p_ref:    (PR, G3)   packed, lane-aligned parameter block (one DMA)
    out_ref:  (T, GP)    lane-dense output slab (real values in lanes 0:O)
    hall_ref: (T, GP)    VMEM scratch holding every step's hidden state
    """
    # Static views / loads from the single packed parameter block.
    wih = p_ref[R_WIH:R_WIH + 1, :]              # (1, 384)  W_ih^T, gate-padded
    bih = p_ref[R_BIH:R_BIH + 1, :]              # (1, 384)  b_ih (+ b_hh folded for r|z)
    bhn = p_ref[R_BHH:R_BHH + 1, 2 * GP:G3]      # (1, 128)  b_hh, n-gate lanes only
    bfc = p_ref[R_BFC:R_BFC + 1, 0:GP]           # (1, 128)  fc1.bias (lanes 0:O)
    whh = p_ref[R_WHH:R_WHH + GP, :]             # (128, 384) W_hh^T, 128 contraction rows
    wfc = p_ref[R_WFC:R_WFC + GP, 0:GP]          # (128, 128) fc1.weight^T, 128 rows

    h = jnp.zeros((1, GP), jnp.float32)          # h_0 = 0, stays in vregs

    # Fully unrolled recurrence (T = 8, fixed).  All slice offsets are multiples
    # of 128 lanes -> no lane rotates on the serial chain, and the MXU LHS is
    # always the full 128-lane h vreg (no repack).
    for t in range(T):
        gx = x_sm[t] * wih + bih                                   # scalar splat, off chain
        gh = jnp.dot(h, whh, preferred_element_type=jnp.float32)   # (1, 384)
        rz = jax.nn.sigmoid(gx[:, 0:2 * GP] + gh[:, 0:2 * GP])     # r|z in one sigmoid
        r = rz[:, 0:GP]
        z = rz[:, GP:2 * GP]
        n = jnp.tanh(gx[:, 2 * GP:G3] + r * (gh[:, 2 * GP:G3] + bhn))
        h = (1.0 - z) * n + z * h                                  # padded lanes stay 0
        hall_ref[t:t + 1, :] = h                                   # store-only side path

    # fc1 over all time steps in one MXU pass; lane-dense (8, 128) store.
    out_ref[...] = (jnp.dot(hall_ref[...], wfc,
                            preferred_element_type=jnp.float32) + bfc)


def pack_params(w_ih, w_hh, b_ih, b_hh, w_fc, b_fc):
    """Pack PyTorch-shaped GRU/Linear params into one lane-aligned f32 block."""
    w_ih = np.asarray(w_ih, np.float32)   # (3H, I)
    w_hh = np.asarray(w_hh, np.float32)   # (3H, H)
    b_ih = np.asarray(b_ih, np.float32)   # (3H,)
    b_hh = np.asarray(b_hh, np.float32)   # (3H,)
    w_fc = np.asarray(w_fc, np.float32)   # (O, H)
    b_fc = np.asarray(b_fc, np.float32)   # (O,)

    P = np.zeros((PR, G3), np.float32)
    for g in range(3):                    # PyTorch gate order: r, z, n
        lo = g * GP
        P[R_WIH, lo:lo + H] = w_ih[g * H:(g + 1) * H, 0]
        if g < 2:                         # fold b_hh into b_ih for the r|z gates
            P[R_BIH, lo:lo + H] = b_ih[g * H:(g + 1) * H] + b_hh[g * H:(g + 1) * H]
        else:                             # n gate keeps b_hh separate (added before r*)
            P[R_BIH, lo:lo + H] = b_ih[g * H:(g + 1) * H]
            P[R_BHH, lo:lo + H] = b_hh[g * H:(g + 1) * H]
        # W_hh^T, zero-padded to 128 contraction rows (rows H:128 stay 0)
        P[R_WHH:R_WHH + H, lo:lo + H] = w_hh[g * H:(g + 1) * H, :].T
    P[R_BFC, 0:O] = b_fc
    P[R_WFC:R_WFC + H, 0:O] = w_fc.T      # rows H:128 stay 0
    return jnp.asarray(P)


def myrnn_forward(x, packed_params):
    # Only batch element B-1 is consumed by fc1(gru_out[:, -1, :]); prune the rest.
    x_seq = x[:, -1, 0].astype(jnp.float32)           # (T,) -> SMEM via scalar prefetch
    out_pad = pl.pallas_call(
        gru_fc_kernel,
        out_shape=jax.ShapeDtypeStruct((T, GP), jnp.float32),
        grid_spec=pltpu.PrefetchScalarGridSpec(
            num_scalar_prefetch=1,                    # x_seq -> SMEM, no VMEM DMA
            grid=(1,),
            in_specs=[
                pl.BlockSpec((PR, G3), lambda i, xs: (0, 0)),   # packed params (1 DMA)
            ],
            out_specs=pl.BlockSpec((T, GP), lambda i, xs: (0, 0)),
            scratch_shapes=[pltpu.VMEM((T, GP), jnp.float32)],  # per-step h snapshots
        ),
        compiler_params=pltpu.CompilerParams(
            dimension_semantics=("arbitrary",)),
    )(x_seq, packed_params)
    return out_pad[:, :O]                              # (T, 5)


def myrnn_reference(x, raw_params):
    """Pure-JAX reference mirroring PyTorch nn.GRU + nn.Linear semantics."""
    w_ih, w_hh, b_ih, b_hh, w_fc, b_fc = raw_params
    Tn, Bn, _ = x.shape
    h = jnp.zeros((Bn, H), jnp.float32)
    outs = []
    for t in range(Tn):
        gx = x[t] @ w_ih.T + b_ih          # (B, 3H)
        gh = h @ w_hh.T + b_hh             # (B, 3H)
        r = jax.nn.sigmoid(gx[:, :H] + gh[:, :H])
        z = jax.nn.sigmoid(gx[:, H:2 * H] + gh[:, H:2 * H])
        n = jnp.tanh(gx[:, 2 * H:] + r * gh[:, 2 * H:])
        h = (1.0 - z) * n + z * h
        outs.append(h)
    gru_out = jnp.stack(outs, axis=0)      # (T, B, H)
    return gru_out[:, -1, :] @ w_fc.T + b_fc


if __name__ == "__main__":
    key = jax.random.PRNGKey(0)
    kx, k0, k1, k2, k3, k4, k5 = jax.random.split(key, 7)

    # PyTorch-style uniform(-1/sqrt(H), 1/sqrt(H)) init, PyTorch-shaped params.
    bound = 1.0 / np.sqrt(H)
    w_ih = jax.random.uniform(k0, (3 * H, I), jnp.float32, -bound, bound)
    w_hh = jax.random.uniform(k1, (3 * H, H), jnp.float32, -bound, bound)
    b_ih = jax.random.uniform(k2, (3 * H,), jnp.float32, -bound, bound)
    b_hh = jax.random.uniform(k3, (3 * H,), jnp.float32, -bound, bound)
    w_fc = jax.random.uniform(k4, (O, H), jnp.float32, -bound, bound)
    b_fc = jax.random.uniform(k5, (O,), jnp.float32, -bound, bound)

    packed = pack_params(w_ih, w_hh, b_ih, b_hh, w_fc, b_fc)
    x = jax.random.normal(kx, (T, B, I), jnp.float32)   # (seq_len, batch, input_size)

    out = jax.block_until_ready(myrnn_forward(x, packed))

    ref = myrnn_reference(x, (w_ih, w_hh, b_ih, b_hh, w_fc, b_fc))
    np.testing.assert_allclose(np.asarray(out), np.asarray(ref),
                               rtol=1e-4, atol=1e-4)

    print("KERNEL_OK")
</pallas_src>

<mosaic_0001>
module attributes {stable_mosaic.version = 11 : i64} {
  func.func @gru_fc_kernel(%arg0: i32, %arg1: memref<8xf32, #tpu.memory_space<smem>>, %arg2: memref<264x384xf32, #tpu.memory_space<vmem>>, %arg3: memref<8x128xf32, #tpu.memory_space<vmem>>, %arg4: memref<8x128xf32, #tpu.memory_space<vmem>>) attributes {dimension_semantics = [#tpu.dimension_semantics<arbitrary>], iteration_bounds = array<i64: 1>, scalar_prefetch = 1 : i64, scratch_operands = 1 : i64, tpu.core_type = #tpu.core_type<tc>, window_params = [{pipeline_mode = #tpu.pipeline_mode<synchronous>, transform_indices = @transform_0, window_bounds = array<i64: 264, 384>}, {pipeline_mode = #tpu.pipeline_mode<synchronous>, transform_indices = @transform_1, window_bounds = array<i64: 8, 128>}]} {
    %c0 = arith.constant 0 : index
    %c0_0 = arith.constant 0 : index
    %0 = vector.load %arg2[%c0, %c0_0] : memref<264x384xf32, #tpu.memory_space<vmem>>, vector<1x384xf32>
    %c1 = arith.constant 1 : index
    %c0_1 = arith.constant 0 : index
    %1 = vector.load %arg2[%c1, %c0_1] : memref<264x384xf32, #tpu.memory_space<vmem>>, vector<1x384xf32>
    %c2 = arith.constant 2 : index
    %c256 = arith.constant 256 : index
    %2 = vector.load %arg2[%c2, %c256] : memref<264x384xf32, #tpu.memory_space<vmem>>, vector<1x128xf32>
    %c3 = arith.constant 3 : index
    %c0_2 = arith.constant 0 : index
    %3 = vector.load %arg2[%c3, %c0_2] : memref<264x384xf32, #tpu.memory_space<vmem>>, vector<1x128xf32>
    %c8 = arith.constant 8 : index
    %c0_3 = arith.constant 0 : index
    %4 = vector.load %arg2[%c8, %c0_3] : memref<264x384xf32, #tpu.memory_space<vmem>>, vector<128x384xf32>
    %c136 = arith.constant 136 : index
    %c0_4 = arith.constant 0 : index
    %5 = vector.load %arg2[%c136, %c0_4] : memref<264x384xf32, #tpu.memory_space<vmem>>, vector<128x128xf32>
    %cst = arith.constant 0.000000e+00 : f32
    %6 = vector.broadcast %cst : f32 to vector<1x128xf32>
    %c0_5 = arith.constant 0 : index
    %7 = memref.load %arg1[%c0_5] : memref<8xf32, #tpu.memory_space<smem>>
    %8 = vector.broadcast %7 : f32 to vector<1x384xf32>
    %9 = arith.mulf %8, %0 : vector<1x384xf32>
    %10 = arith.addf %9, %1 : vector<1x384xf32>
    %cst_6 = arith.constant dense<0.000000e+00> : vector<1x384xf32>
    %11 = tpu.matmul %6, %4, %cst_6 {dimension_numbers = #tpu.dot_dimension_numbers<[1], [0], [0], [1], [0, 0, 1, 1], [], []>} : vector<1x128xf32>, vector<128x384xf32>, vector<1x384xf32> -> vector<1x384xf32>
    %12 = vector.extract_strided_slice %10 {offsets = [0, 0], sizes = [1, 256], strides = [1, 1]} : vector<1x384xf32> to vector<1x256xf32>
    %13 = vector.extract_strided_slice %11 {offsets = [0, 0], sizes = [1, 256], strides = [1, 1]} : vector<1x384xf32> to vector<1x256xf32>
    %14 = arith.addf %12, %13 : vector<1x256xf32>
    %15 = arith.negf %14 : vector<1x256xf32>
    %16 = math.exp %15 : vector<1x256xf32>
    %cst_7 = arith.constant 1.000000e+00 : f32
    %17 = vector.broadcast %cst_7 : f32 to vector<1x256xf32>
    %18 = arith.addf %17, %16 : vector<1x256xf32>
    %19 = arith.divf %17, %18 : vector<1x256xf32>
    %20 = vector.extract_strided_slice %19 {offsets = [0, 0], sizes = [1, 128], strides = [1, 1]} : vector<1x256xf32> to vector<1x128xf32>
    %21 = vector.extract_strided_slice %19 {offsets = [0, 128], sizes = [1, 128], strides = [1, 1]} : vector<1x256xf32> to vector<1x128xf32>
    %22 = vector.extract_strided_slice %10 {offsets = [0, 256], sizes = [1, 128], strides = [1, 1]} : vector<1x384xf32> to vector<1x128xf32>
    %23 = vector.extract_strided_slice %11 {offsets = [0, 256], sizes = [1, 128], strides = [1, 1]} : vector<1x384xf32> to vector<1x128xf32>
    %24 = arith.addf %23, %2 : vector<1x128xf32>
    %25 = arith.mulf %20, %24 : vector<1x128xf32>
    %26 = arith.addf %22, %25 : vector<1x128xf32>
    %27 = math.tanh %26 : vector<1x128xf32>
    %cst_8 = arith.constant 1.000000e+00 : f32
    %28 = vector.broadcast %cst_8 : f32 to vector<1x128xf32>
    %29 = arith.subf %28, %21 : vector<1x128xf32>
    %30 = arith.mulf %29, %27 : vector<1x128xf32>
    %31 = arith.mulf %21, %6 : vector<1x128xf32>
    %32 = arith.addf %30, %31 : vector<1x128xf32>
    %c0_9 = arith.constant 0 : index
    %c0_10 = arith.constant 0 : index
    %33 = vector.load %arg4[%c0_9, %c0_10] : memref<8x128xf32, #tpu.memory_space<vmem>>, vector<1x128xf32>
    tpu.vector_store %arg4[%c0_9, %c0_10], %32 {strides = array<i32>} : memref<8x128xf32, #tpu.memory_space<vmem>>, vector<1x128xf32>,
    %c1_11 = arith.constant 1 : index
    %34 = memref.load %arg1[%c1_11] : memref<8xf32, #tpu.memory_space<smem>>
    %35 = vector.broadcast %34 : f32 to vector<1x384xf32>
    %36 = arith.mulf %35, %0 : vector<1x384xf32>
    %37 = arith.addf %36, %1 : vector<1x384xf32>
    %cst_12 = arith.constant dense<0.000000e+00> : vector<1x384xf32>
    %38 = tpu.matmul %32, %4, %cst_12 {dimension_numbers = #tpu.dot_dimension_numbers<[1], [0], [0], [1], [0, 0, 1, 1], [], []>} : vector<1x128xf32>, vector<128x384xf32>, vector<1x384xf32> -> vector<1x384xf32>
    %39 = vector.extract_strided_slice %37 {offsets = [0, 0], sizes = [1, 256], strides = [1, 1]} : vector<1x384xf32> to vector<1x256xf32>
    %40 = vector.extract_strided_slice %38 {offsets = [0, 0], sizes = [1, 256], strides = [1, 1]} : vector<1x384xf32> to vector<1x256xf32>
    %41 = arith.addf %39, %40 : vector<1x256xf32>
    %42 = arith.negf %41 : vector<1x256xf32>
    %43 = math.exp %42 : vector<1x256xf32>
    %cst_13 = arith.constant 1.000000e+00 : f32
    %44 = vector.broadcast %cst_13 : f32 to vector<1x256xf32>
    %45 = arith.addf %44, %43 : vector<1x256xf32>
    %46 = arith.divf %44, %45 : vector<1x256xf32>
    %47 = vector.extract_strided_slice %46 {offsets = [0, 0], sizes = [1, 128], strides = [1, 1]} : vector<1x256xf32> to vector<1x128xf32>
    %48 = vector.extract_strided_slice %46 {offsets = [0, 128], sizes = [1, 128], strides = [1, 1]} : vector<1x256xf32> to vector<1x128xf32>
    %49 = vector.extract_strided_slice %37 {offsets = [0, 256], sizes = [1, 128], strides = [1, 1]} : vector<1x384xf32> to vector<1x128xf32>
    %50 = vector.extract_strided_slice %38 {offsets = [0, 256], sizes = [1, 128], strides = [1, 1]} : vector<1x384xf32> to vector<1x128xf32>
    %51 = arith.addf %50, %2 : vector<1x128xf32>
    %52 = arith.mulf %47, %51 : vector<1x128xf32>
    %53 = arith.addf %49, %52 : vector<1x128xf32>
    %54 = math.tanh %53 : vector<1x128xf32>
    %cst_14 = arith.constant 1.000000e+00 : f32
    %55 = vector.broadcast %cst_14 : f32 to vector<1x128xf32>
    %56 = arith.subf %55, %48 : vector<1x128xf32>
    %57 = arith.mulf %56, %54 : vector<1x128xf32>
    %58 = arith.mulf %48, %32 : vector<1x128xf32>
    %59 = arith.addf %57, %58 : vector<1x128xf32>
    %c1_15 = arith.constant 1 : index
    %c0_16 = arith.constant 0 : index
    %60 = vector.load %arg4[%c1_15, %c0_16] : memref<8x128xf32, #tpu.memory_space<vmem>>, vector<1x128xf32>
    tpu.vector_store %arg4[%c1_15, %c0_16], %59 {strides = array<i32>} : memref<8x128xf32, #tpu.memory_space<vmem>>, vector<1x128xf32>,
    %c2_17 = arith.constant 2 : index
    %61 = memref.load %arg1[%c2_17] : memref<8xf32, #tpu.memory_space<smem>>
    %62 = vector.broadcast %61 : f32 to vector<1x384xf32>
    %63 = arith.mulf %62, %0 : vector<1x384xf32>
    %64 = arith.addf %63, %1 : vector<1x384xf32>
    %cst_18 = arith.constant dense<0.000000e+00> : vector<1x384xf32>
    %65 = tpu.matmul %59, %4, %cst_18 {dimension_numbers = #tpu.dot_dimension_numbers<[1], [0], [0], [1], [0, 0, 1, 1], [], []>} : vector<1x128xf32>, vector<128x384xf32>, vector<1x384xf32> -> vector<1x384xf32>
    %66 = vector.extract_strided_slice %64 {offsets = [0, 0], sizes = [1, 256], strides = [1, 1]} : vector<1x384xf32> to vector<1x256xf32>
    %67 = vector.extract_strided_slice %65 {offsets = [0, 0], sizes = [1, 256], strides = [1, 1]} : vector<1x384xf32> to vector<1x256xf32>
    %68 = arith.addf %66, %67 : vector<1x256xf32>
    %69 = arith.negf %68 : vector<1x256xf32>
    %70 = math.exp %69 : vector<1x256xf32>
    %cst_19 = arith.constant 1.000000e+00 : f32
    %71 = vector.broadcast %cst_19 : f32 to vector<1x256xf32>
    %72 = arith.addf %71, %70 : vector<1x256xf32>
    %73 = arith.divf %71, %72 : vector<1x256xf32>
    %74 = vector.extract_strided_slice %73 {offsets = [0, 0], sizes = [1, 128], strides = [1, 1]} : vector<1x256xf32> to vector<1x128xf32>
    %75 = vector.extract_strided_slice %73 {offsets = [0, 128], sizes = [1, 128], strides = [1, 1]} : vector<1x256xf32> to vector<1x128xf32>
    %76 = vector.extract_strided_slice %64 {offsets = [0, 256], sizes = [1, 128], strides = [1, 1]} : vector<1x384xf32> to vector<1x128xf32>
    %77 = vector.extract_strided_slice %65 {offsets = [0, 256], sizes = [1, 128], strides = [1, 1]} : vector<1x384xf32> to vector<1x128xf32>
    %78 = arith.addf %77, %2 : vector<1x128xf32>
    %79 = arith.mulf %74, %78 : vector<1x128xf32>
    %80 = arith.addf %76, %79 : vector<1x128xf32>
    %81 = math.tanh %80 : vector<1x128xf32>
    %cst_20 = arith.constant 1.000000e+00 : f32
    %82 = vector.broadcast %cst_20 : f32 to vector<1x128xf32>
    %83 = arith.subf %82, %75 : vector<1x128xf32>
    %84 = arith.mulf %83, %81 : vector<1x128xf32>
    %85 = arith.mulf %75, %59 : vector<1x128xf32>
    %86 = arith.addf %84, %85 : vector<1x128xf32>
    %c2_21 = arith.constant 2 : index
    %c0_22 = arith.constant 0 : index
    %87 = vector.load %arg4[%c2_21, %c0_22] : memref<8x128xf32, #tpu.memory_space<vmem>>, vector<1x128xf32>
    tpu.vector_store %arg4[%c2_21, %c0_22], %86 {strides = array<i32>} : memref<8x128xf32, #tpu.memory_space<vmem>>, vector<1x128xf32>,
    %c3_23 = arith.constant 3 : index
    %88 = memref.load %arg1[%c3_23] : memref<8xf32, #tpu.memory_space<smem>>
    %89 = vector.broadcast %88 : f32 to vector<1x384xf32>
    %90 = arith.mulf %89, %0 : vector<1x384xf32>
    %91 = arith.addf %90, %1 : vector<1x384xf32>
    %cst_24 = arith.constant dense<0.000000e+00> : vector<1x384xf32>
    %92 = tpu.matmul %86, %4, %cst_24 {dimension_numbers = #tpu.dot_dimension_numbers<[1], [0], [0], [1], [0, 0, 1, 1], [], []>} : vector<1x128xf32>, vector<128x384xf32>, vector<1x384xf32> -> vector<1x384xf32>
    %93 = vector.extract_strided_slice %91 {offsets = [0, 0], sizes = [1, 256], strides = [1, 1]} : vector<1x384xf32> to vector<1x256xf32>
    %94 = vector.extract_strided_slice %92 {offsets = [0, 0], sizes = [1, 256], strides = [1, 1]} : vector<1x384xf32> to vector<1x256xf32>
    %95 = arith.addf %93, %94 : vector<1x256xf32>
    %96 = arith.negf %95 : vector<1x256xf32>
    %97 = math.exp %96 : vector<1x256xf32>
    %cst_25 = arith.constant 1.000000e+00 : f32
    %98 = vector.broadcast %cst_25 : f32 to vector<1x256xf32>
    %99 = arith.addf %98, %97 : vector<1x256xf32>
    %100 = arith.divf %98, %99 : vector<1x256xf32>
    %101 = vector.extract_strided_slice %100 {offsets = [0, 0], sizes = [1, 128], strides = [1, 1]} : vector<1x256xf32> to vector<1x128xf32>
    %102 = vector.extract_strided_slice %100 {offsets = [0, 128], sizes = [1, 128], strides = [1, 1]} : vector<1x256xf32> to vector<1x128xf32>
    %103 = vector.extract_strided_slice %91 {offsets = [0, 256], sizes = [1, 128], strides = [1, 1]} : vector<1x384xf32> to vector<1x128xf32>
    %104 = vector.extract_strided_slice %92 {offsets = [0, 256], sizes = [1, 128], strides = [1, 1]} : vector<1x384xf32> to vector<1x128xf32>
    %105 = arith.addf %104, %2 : vector<1x128xf32>
    %106 = arith.mulf %101, %105 : vector<1x128xf32>
    %107 = arith.addf %103, %106 : vector<1x128xf32>
    %108 = math.tanh %107 : vector<1x128xf32>
    %cst_26 = arith.constant 1.000000e+00 : f32
    %109 = vector.broadcast %cst_26 : f32 to vector<1x128xf32>
    %110 = arith.subf %109, %102 : vector<1x128xf32>
    %111 = arith.mulf %110, %108 : vector<1x128xf32>
    %112 = arith.mulf %102, %86 : vector<1x128xf32>
    %113 = arith.addf %111, %112 : vector<1x128xf32>
    %c3_27 = arith.constant 3 : index
    %c0_28 = arith.constant 0 : index
    %114 = vector.load %arg4[%c3_27, %c0_28] : memref<8x128xf32, #tpu.memory_space<vmem>>, vector<1x128xf32>
    tpu.vector_store %arg4[%c3_27, %c0_28], %113 {strides = array<i32>} : memref<8x128xf32, #tpu.memory_space<vmem>>, vector<1x128xf32>,
    %c4 = arith.constant 4 : index
    %115 = memref.load %arg1[%c4] : memref<8xf32, #tpu.memory_space<smem>>
    %116 = vector.broadcast %115 : f32 to vector<1x384xf32>
    %117 = arith.mulf %116, %0 : vector<1x384xf32>
    %118 = arith.addf %117, %1 : vector<1x384xf32>
    %cst_29 = arith.constant dense<0.000000e+00> : vector<1x384xf32>
    %119 = tpu.matmul %113, %4, %cst_29 {dimension_numbers = #tpu.dot_dimension_numbers<[1], [0], [0], [1], [0, 0, 1, 1], [], []>} : vector<1x128xf32>, vector<128x384xf32>, vector<1x384xf32> -> vector<1x384xf32>
    %120 = vector.extract_strided_slice %118 {offsets = [0, 0], sizes = [1, 256], strides = [1, 1]} : vector<1x384xf32> to vector<1x256xf32>
    %121 = vector.extract_strided_slice %119 {offsets = [0, 0], sizes = [1, 256], strides = [1, 1]} : vector<1x384xf32> to vector<1x256xf32>
    %122 = arith.addf %120, %121 : vector<1x256xf32>
    %123 = arith.negf %122 : vector<1x256xf32>
    %124 = math.exp %123 : vector<1x256xf32>
    %cst_30 = arith.constant 1.000000e+00 : f32
    %125 = vector.broadcast %cst_30 : f32 to vector<1x256xf32>
    %126 = arith.addf %125, %124 : vector<1x256xf32>
    %127 = arith.divf %125, %126 : vector<1x256xf32>
    %128 = vector.extract_strided_slice %127 {offsets = [0, 0], sizes = [1, 128], strides = [1, 1]} : vector<1x256xf32> to vector<1x128xf32>
    %129 = vector.extract_strided_slice %127 {offsets = [0, 128], sizes = [1, 128], strides = [1, 1]} : vector<1x256xf32> to vector<1x128xf32>
    %130 = vector.extract_strided_slice %118 {offsets = [0, 256], sizes = [1, 128], strides = [1, 1]} : vector<1x384xf32> to vector<1x128xf32>
    %131 = vector.extract_strided_slice %119 {offsets = [0, 256], sizes = [1, 128], strides = [1, 1]} : vector<1x384xf32> to vector<1x128xf32>
    %132 = arith.addf %131, %2 : vector<1x128xf32>
    %133 = arith.mulf %128, %132 : vector<1x128xf32>
    %134 = arith.addf %130, %133 : vector<1x128xf32>
    %135 = math.tanh %134 : vector<1x128xf32>
    %cst_31 = arith.constant 1.000000e+00 : f32
    %136 = vector.broadcast %cst_31 : f32 to vector<1x128xf32>
    %137 = arith.subf %136, %129 : vector<1x128xf32>
    %138 = arith.mulf %137, %135 : vector<1x128xf32>
    %139 = arith.mulf %129, %113 : vector<1x128xf32>
    %140 = arith.addf %138, %139 : vector<1x128xf32>
    %c4_32 = arith.constant 4 : index
    %c0_33 = arith.constant 0 : index
    %141 = vector.load %arg4[%c4_32, %c0_33] : memref<8x128xf32, #tpu.memory_space<vmem>>, vector<1x128xf32>
    tpu.vector_store %arg4[%c4_32, %c0_33], %140 {strides = array<i32>} : memref<8x128xf32, #tpu.memory_space<vmem>>, vector<1x128xf32>,
    %c5 = arith.constant 5 : index
    %142 = memref.load %arg1[%c5] : memref<8xf32, #tpu.memory_space<smem>>
    %143 = vector.broadcast %142 : f32 to vector<1x384xf32>
    %144 = arith.mulf %143, %0 : vector<1x384xf32>
    %145 = arith.addf %144, %1 : vector<1x384xf32>
    %cst_34 = arith.constant dense<0.000000e+00> : vector<1x384xf32>
    %146 = tpu.matmul %140, %4, %cst_34 {dimension_numbers = #tpu.dot_dimension_numbers<[1], [0], [0], [1], [0, 0, 1, 1], [], []>} : vector<1x128xf32>, vector<128x384xf32>, vector<1x384xf32> -> vector<1x384xf32>
    %147 = vector.extract_strided_slice %145 {offsets = [0, 0], sizes = [1, 256], strides = [1, 1]} : vector<1x384xf32> to vector<1x256xf32>
    %148 = vector.extract_strided_slice %146 {offsets = [0, 0], sizes = [1, 256], strides = [1, 1]} : vector<1x384xf32> to vector<1x256xf32>
    %149 = arith.addf %147, %148 : vector<1x256xf32>
    %150 = arith.negf %149 : vector<1x256xf32>
    %151 = math.exp %150 : vector<1x256xf32>
    %cst_35 = arith.constant 1.000000e+00 : f32
    %152 = vector.broadcast %cst_35 : f32 to vector<1x256xf32>
    %153 = arith.addf %152, %151 : vector<1x256xf32>
    %154 = arith.divf %152, %153 : vector<1x256xf32>
    %155 = vector.extract_strided_slice %154 {offsets = [0, 0], sizes = [1, 128], strides = [1, 1]} : vector<1x256xf32> to vector<1x128xf32>
    %156 = vector.extract_strided_slice %154 {offsets = [0, 128], sizes = [1, 128], strides = [1, 1]} : vector<1x256xf32> to vector<1x128xf32>
    %157 = vector.extract_strided_slice %145 {offsets = [0, 256], sizes = [1, 128], strides = [1, 1]} : vector<1x384xf32> to vector<1x128xf32>
    %158 = vector.extract_strided_slice %146 {offsets = [0, 256], sizes = [1, 128], strides = [1, 1]} : vector<1x384xf32> to vector<1x128xf32>
    %159 = arith.addf %158, %2 : vector<1x128xf32>
    %160 = arith.mulf %155, %159 : vector<1x128xf32>
    %161 = arith.addf %157, %160 : vector<1x128xf32>
    %162 = math.tanh %161 : vector<1x128xf32>
    %cst_36 = arith.constant 1.000000e+00 : f32
    %163 = vector.broadcast %cst_36 : f32 to vector<1x128xf32>
    %164 = arith.subf %163, %156 : vector<1x128xf32>
    %165 = arith.mulf %164, %162 : vector<1x128xf32>
    %166 = arith.mulf %156, %140 : vector<1x128xf32>
    %167 = arith.addf %165, %166 : vector<1x128xf32>
    %c5_37 = arith.constant 5 : index
    %c0_38 = arith.constant 0 : index
    %168 = vector.load %arg4[%c5_37, %c0_38] : memref<8x128xf32, #tpu.memory_space<vmem>>, vector<1x128xf32>
    tpu.vector_store %arg4[%c5_37, %c0_38], %167 {strides = array<i32>} : memref<8x128xf32, #tpu.memory_space<vmem>>, vector<1x128xf32>,
    %c6 = arith.constant 6 : index
    %169 = memref.load %arg1[%c6] : memref<8xf32, #tpu.memory_space<smem>>
    %170 = vector.broadcast %169 : f32 to vector<1x384xf32>
    %171 = arith.mulf %170, %0 : vector<1x384xf32>
    %172 = arith.addf %171, %1 : vector<1x384xf32>
    %cst_39 = arith.constant dense<0.000000e+00> : vector<1x384xf32>
    %173 = tpu.matmul %167, %4, %cst_39 {dimension_numbers = #tpu.dot_dimension_numbers<[1], [0], [0], [1], [0, 0, 1, 1], [], []>} : vector<1x128xf32>, vector<128x384xf32>, vector<1x384xf32> -> vector<1x384xf32>
    %174 = vector.extract_strided_slice %172 {offsets = [0, 0], sizes = [1, 256], strides = [1, 1]} : vector<1x384xf32> to vector<1x256xf32>
    %175 = vector.extract_strided_slice %173 {offsets = [0, 0], sizes = [1, 256], strides = [1, 1]} : vector<1x384xf32> to vector<1x256xf32>
    %176 = arith.addf %174, %175 : vector<1x256xf32>
    %177 = arith.negf %176 : vector<1x256xf32>
    %178 = math.exp %177 : vector<1x256xf32>
    %cst_40 = arith.constant 1.000000e+00 : f32
    %179 = vector.broadcast %cst_40 : f32 to vector<1x256xf32>
    %180 = arith.addf %179, %178 : vector<1x256xf32>
    %181 = arith.divf %179, %180 : vector<1x256xf32>
    %182 = vector.extract_strided_slice %181 {offsets = [0, 0], sizes = [1, 128], strides = [1, 1]} : vector<1x256xf32> to vector<1x128xf32>
    %183 = vector.extract_strided_slice %181 {offsets = [0, 128], sizes = [1, 128], strides = [1, 1]} : vector<1x256xf32> to vector<1x128xf32>
    %184 = vector.extract_strided_slice %172 {offsets = [0, 256], sizes = [1, 128], strides = [1, 1]} : vector<1x384xf32> to vector<1x128xf32>
    %185 = vector.extract_strided_slice %173 {offsets = [0, 256], sizes = [1, 128], strides = [1, 1]} : vector<1x384xf32> to vector<1x128xf32>
    %186 = arith.addf %185, %2 : vector<1x128xf32>
    %187 = arith.mulf %182, %186 : vector<1x128xf32>
    %188 = arith.addf %184, %187 : vector<1x128xf32>
    %189 = math.tanh %188 : vector<1x128xf32>
    %cst_41 = arith.constant 1.000000e+00 : f32
    %190 = vector.broadcast %cst_41 : f32 to vector<1x128xf32>
    %191 = arith.subf %190, %183 : vector<1x128xf32>
    %192 = arith.mulf %191, %189 : vector<1x128xf32>
    %193 = arith.mulf %183, %167 : vector<1x128xf32>
    %194 = arith.addf %192, %193 : vector<1x128xf32>
    %c6_42 = arith.constant 6 : index
    %c0_43 = arith.constant 0 : index
    %195 = vector.load %arg4[%c6_42, %c0_43] : memref<8x128xf32, #tpu.memory_space<vmem>>, vector<1x128xf32>
    tpu.vector_store %arg4[%c6_42, %c0_43], %194 {strides = array<i32>} : memref<8x128xf32, #tpu.memory_space<vmem>>, vector<1x128xf32>,
    %c7 = arith.constant 7 : index
    %196 = memref.load %arg1[%c7] : memref<8xf32, #tpu.memory_space<smem>>
    %197 = vector.broadcast %196 : f32 to vector<1x384xf32>
    %198 = arith.mulf %197, %0 : vector<1x384xf32>
    %199 = arith.addf %198, %1 : vector<1x384xf32>
    %cst_44 = arith.constant dense<0.000000e+00> : vector<1x384xf32>
    %200 = tpu.matmul %194, %4, %cst_44 {dimension_numbers = #tpu.dot_dimension_numbers<[1], [0], [0], [1], [0, 0, 1, 1], [], []>} : vector<1x128xf32>, vector<128x384xf32>, vector<1x384xf32> -> vector<1x384xf32>
    %201 = vector.extract_strided_slice %199 {offsets = [0, 0], sizes = [1, 256], strides = [1, 1]} : vector<1x384xf32> to vector<1x256xf32>
    %202 = vector.extract_strided_slice %200 {offsets = [0, 0], sizes = [1, 256], strides = [1, 1]} : vector<1x384xf32> to vector<1x256xf32>
    %203 = arith.addf %201, %202 : vector<1x256xf32>
    %204 = arith.negf %203 : vector<1x256xf32>
    %205 = math.exp %204 : vector<1x256xf32>
    %cst_45 = arith.constant 1.000000e+00 : f32
    %206 = vector.broadcast %cst_45 : f32 to vector<1x256xf32>
    %207 = arith.addf %206, %205 : vector<1x256xf32>
    %208 = arith.divf %206, %207 : vector<1x256xf32>
    %209 = vector.extract_strided_slice %208 {offsets = [0, 0], sizes = [1, 128], strides = [1, 1]} : vector<1x256xf32> to vector<1x128xf32>
    %210 = vector.extract_strided_slice %208 {offsets = [0, 128], sizes = [1, 128], strides = [1, 1]} : vector<1x256xf32> to vector<1x128xf32>
    %211 = vector.extract_strided_slice %199 {offsets = [0, 256], sizes = [1, 128], strides = [1, 1]} : vector<1x384xf32> to vector<1x128xf32>
    %212 = vector.extract_strided_slice %200 {offsets = [0, 256], sizes = [1, 128], strides = [1, 1]} : vector<1x384xf32> to vector<1x128xf32>
    %213 = arith.addf %212, %2 : vector<1x128xf32>
    %214 = arith.mulf %209, %213 : vector<1x128xf32>
    %215 = arith.addf %211, %214 : vector<1x128xf32>
    %216 = math.tanh %215 : vector<1x128xf32>
    %cst_46 = arith.constant 1.000000e+00 : f32
    %217 = vector.broadcast %cst_46 : f32 to vector<1x128xf32>
    %218 = arith.subf %217, %210 : vector<1x128xf32>
    %219 = arith.mulf %218, %216 : vector<1x128xf32>
    %220 = arith.mulf %210, %194 : vector<1x128xf32>
    %221 = arith.addf %219, %220 : vector<1x128xf32>
    %c7_47 = arith.constant 7 : index
    %c0_48 = arith.constant 0 : index
    %222 = vector.load %arg4[%c7_47, %c0_48] : memref<8x128xf32, #tpu.memory_space<vmem>>, vector<1x128xf32>
    tpu.vector_store %arg4[%c7_47, %c0_48], %221 {strides = array<i32>} : memref<8x128xf32, #tpu.memory_space<vmem>>, vector<1x128xf32>,
    %c0_49 = arith.constant 0 : index
    %c0_50 = arith.constant 0 : index
    %223 = vector.load %arg4[%c0_49, %c0_50] : memref<8x128xf32, #tpu.memory_space<vmem>>, vector<8x128xf32>
    %cst_51 = arith.constant dense<0.000000e+00> : vector<8x128xf32>
    %224 = tpu.matmul %223, %5, %cst_51 {dimension_numbers = #tpu.dot_dimension_numbers<[1], [0], [0], [1], [0, 0, 1, 1], [], []>} : vector<8x128xf32>, vector<128x128xf32>, vector<8x128xf32> -> vector<8x128xf32>
    %225 = vector.broadcast %3 : vector<1x128xf32> to vector<8x128xf32>
    %226 = arith.addf %224, %225 : vector<8x128xf32>
    %c0_52 = arith.constant 0 : index
    %c0_53 = arith.constant 0 : index
    %227 = vector.load %arg3[%c0_52, %c0_53] : memref<8x128xf32, #tpu.memory_space<vmem>>, vector<8x128xf32>
    tpu.vector_store %arg3[%c0_52, %c0_53], %226 {strides = array<i32>} : memref<8x128xf32, #tpu.memory_space<vmem>>, vector<8x128xf32>,
    return
  }
  func.func @transform_0(%arg0: i32, %arg1: memref<8xf32, #tpu.memory_space<smem>>) -> (i32, i32) {
    %c0_i32 = arith.constant 0 : i32
    %c0_i32_0 = arith.constant 0 : i32
    %c0_i32_1 = arith.constant 0 : i32
    return %c0_i32, %c0_i32_0 : i32, i32
  }
  func.func @transform_1(%arg0: i32, %arg1: memref<8xf32, #tpu.memory_space<smem>>) -> (i32, i32) {
    %c0_i32 = arith.constant 0 : i32
    %c0_i32_0 = arith.constant 0 : i32
    %c0_i32_1 = arith.constant 0 : i32
    return %c0_i32, %c0_i32_0 : i32, i32
  }
}

</mosaic_0001>

<bundles_post_ra>
// kernel: tpu_custom_call.1
= control target key start
LH: loop header
LB: loop body
LE: loop exit
PB: predicated region body
PF: predicated region fallthrough
CT: control target
= control target key end

     0   :  { %s2308_s9 = smov [#allocation4]   ;;  %s3184_s0 = inlined_call_operand.hbm [shape: f32[8], index: 0, kind: input, shape index: {}]   ;;  %s3185_s1 = inlined_call_operand.hbm [shape: f32[264,384], index: 1, kind: input, shape index: {}]   ;;  %s3186_s2 = inlined_call_operand.hbm [shape: f32[8,128], index: 2, kind: output, shape index: {}]  }
   0x1   :  { %8 = dma.hbm_to_smem %s3184_s0, 16, %s2308_s9, [#allocation3] }
   0x2   :  { %2302 = dma.done.wait [#allocation3], 16 }
   0x3   :  { %2303 = vsyncadd [#allocation3], 4294967280 }
   0x4   :  { %10 = sfence }
   0x5   :  { %11 = vsyncpa [#allocation6], 0 }
   0x6   :  { %12 = vsyncpa [#allocation7], 0  ;;  %s2309_s12 = smov [#allocation5]  }
   0x7   :  { %s18_s13 = sshll.u32 %s2309_s12, 4  ;;  %s19_s13 = int_to_ptr.vmem [resolvable:$true] %s18_s13 }
   0x8   :  { %s2270_s14 = scalar_lea.vmem %s19_s13, 12672  ;;  %p2275_p1 = scmp.lt.s32.totalorder %s19_s13, %s19_s13 }
   0x9   :  { %p2271_p0 = scmp.ne.s32.totalorder %s19_s13, %s2270_s14  ;;  %p2276_p2 = scmp.lt.s32.totalorder %s2270_s14, %s2270_s14 }
   0xb   :  { %p2277_p3 = por %p2276_p2, %p2275_p1 }
   0xd   :  { %p2278_p4 = pnand %p2277_p3, %p2271_p0 }
   0xf   :  { %2281 = shalt.err (!%p2278_p4)
}
  0x10   :  { %s2310_s15 = smov 384   ;;  %s2311_s16 = smov 24  }
  0x11   :  { %24 = dma.hbm_to_vmem [thread:$0]  %s3185_s1, 12672, %s19_s13, [#allocation6], %s2310_s15, %s2310_s15, %s2311_s16  }
  0x12   :  { %2304 = dma.done.wait [#allocation6], 12672  }
  0x13   :  { %2305 = vsyncadd [#allocation6], 4294954624  ;;  %v3187_v0 = vmov 0.0   ;;  %vm2313_vm0 = vmmov 0   ;;  %v2341_v1 = vld [vmem:[#allocation5 + $0x188] sm:$0xff]  ;;  %v2343_v2 = vld [vmem:[#allocation5 + $0x180] sm:$0xff]  ;;  %v248_v51 = vlaneseq }
  0x14   :  { %165 = vmatprep.mubr.f32.mxu0 %v3187_v0  ;;  %1832 = vmatprep.subr.mxu1 %v3187_v0  ;;  %3215 = vst [vmem:[#allocation12_spill] sm:$0xff] %v2341_v1  ;;  %v2345_v3 = vld [vmem:[#allocation5 + $0x170] sm:$0xff]  ;;  %v2348_v4 = vld [vmem:[#allocation5 + $0x168] sm:$0xff]  ;;  %v2351_v5 = vld [vmem:[#allocation5 + $0x158] sm:$0xff]  ;;  %s97_s0 = sld [smem:[#allocation4]]  ;;  %s2315_s25 = smov [#allocation8]  }
  0x15   :  { %1864 = vmatprep.mubr.msk.f32.mxu1 %vm2313_vm0, %v3187_v0  ;;  %101 = vmatprep.subr.mxu0 %v2341_v1  ;;  %v2354_v6 = vld [vmem:[#allocation5 + $0x150] sm:$0xff]  ;;  %v2357_v7 = vld [vmem:[#allocation5 + $0x140] sm:$0xff]  ;;  %v2360_v8 = vld [vmem:[#allocation5 + $0x138] sm:$0xff]  ;;  %v2314_v49 = vmov 1966171168   ;;  %v249_v53 = vshrl.u32 %v248_v51, 7 }
  0x16   :  { %102 = vmatpush1.msra.mxu0 %v2343_v2  ;;  %v2363_v9 = vld [vmem:[#allocation5 + $0x128] sm:$0xff]  ;;  %v2366_v10 = vld [vmem:[#allocation5 + $0x120] sm:$0xff]  ;;  %v2369_v11 = vld [vmem:[#allocation5 + $0x110] sm:$0xff]  ;;  %v246_v50 = vunpack.c.l.s4 %v2314_v49  ;;  %s1665_s1 = sld [smem:[#allocation4 + $0x1]]  ;;  %s1655_s26 = sshll.u32 %s2315_s25, 4  ;;  %s1656_s26 = int_to_ptr.vmem [resolvable:$true] %s1655_s26 }
  0x17   :  { %103 = vmatprep.subr.mxu0 %v2345_v3  ;;  %v2372_v12 = vld [vmem:[#allocation5 + $0x108] sm:$0xff]  ;;  %v2375_v13 = vld [vmem:[#allocation5 + $0xf8] sm:$0xff]  ;;  %v2377_v14 = vld [vmem:[#allocation5 + $0x190] sm:$0xff]  ;;  %s1667_s19 = sld [smem:[#allocation4 + $0x2]]  ;;  %s2282_s27 = scalar_lea.vmem %s1656_s26, 128 }
  0x18   :  { %104 = vmatpush1.msra.mxu0 %v2348_v4  ;;  %v2380_v15 = vld [vmem:[#allocation5 + $0xf0] sm:$0xff]  ;;  %1833 = vmatpush3.msra.mxu1 %v2377_v14  ;;  %v2383_v16 = vld [vmem:[#allocation5 + $0x178] sm:$0xff]  ;;  %v2386_v17 = vld [vmem:[#allocation5 + $0xe0] sm:$0xff]  ;;  %v247_v52 = vunpack.c.0.s8 %v246_v50  ;;  %s1669_s20 = sld [smem:[#allocation4 + $0x3]]  ;;  %p2283_p5 = scmp.ne.s32.totalorder %s1656_s26, %s2282_s27 }
  0x19   :  { %105 = vmatprep.subr.mxu0 %v2351_v5  ;;  %1834 = vmatprep.subr.mxu1 %v3187_v0  ;;  %v2389_v18 = vld [vmem:[#allocation5 + $0x160] sm:$0xff]  ;;  %v2392_v19 = vld [vmem:[#allocation5 + $0xd8] sm:$0xff]  ;;  %v2396_v20 = vld [vmem:[#allocation5 + $0xc8] sm:$0xff]  ;;  %s1671_s21 = sld [smem:[#allocation4 + $0x4]]  ;;  %p2287_p6 = scmp.lt.s32.totalorder %s1656_s26, %s1656_s26 }
  0x1a   :  { %106 = vmatpush1.msra.mxu0 %v2354_v6  ;;  %1835 = vmatpush3.msra.mxu1 %v2383_v16  ;;  %v2399_v21 = vld [vmem:[#allocation5 + $0x148] sm:$0xff]  ;;  %v2402_v22 = vld [vmem:[#allocation5 + $0xc0] sm:$0xff]  ;;  %v2406_v23 = vld [vmem:[#allocation5 + $0xb0] sm:$0xff]  ;;  %v98_v55 = vstv %s97_s0  ;;  %v2574_v58 = vsub.s32 %v247_v52, %v249_v53  ;;  %s1673_s22 = sld [smem:[#allocation4 + $0x5]]  ;;  %p2288_p7 = scmp.lt.s32.totalorder %s2282_s27, %s2282_s27 }
  0x1b   :  { %107 = vmatprep.subr.mxu0 %v2357_v7  ;;  %1836 = vmatprep.subr.mxu1 %v3187_v0  ;;  %v2409_v24 = vld [vmem:[#allocation5 + $0x130] sm:$0xff]  ;;  %v2412_v25 = vld [vmem:[#allocation5 + $0xa8] sm:$0xff]  ;;  %v2416_v26 = vld [vmem:[#allocation5 + $0x98] sm:$0xff]  ;;  %s1675_s23 = sld [smem:[#allocation4 + $0x6]] }
  0x1c   :  { %108 = vmatpush1.msra.mxu0 %v2360_v8  ;;  %1837 = vmatpush3.msra.mxu1 %v2389_v18  ;;  %v2419_v27 = vld [vmem:[#allocation5 + $0x118] sm:$0xff]  ;;  %v2422_v28 = vld [vmem:[#allocation5 + $0x90] sm:$0xff]  ;;  %v2426_v29 = vld [vmem:[#allocation5 + $0x80] sm:$0xff]  ;;  %3223 = vst [vmem:[#allocation20_spill] sm:$0xff] %v2574_v58  ;;  %s1677_s24 = sld [smem:[#allocation4 + $0x7]]  ;;  %p2289_p8 = por %p2288_p7, %p2287_p6 }
  0x1d   :  { %109 = vmatprep.subr.mxu0 %v2363_v9  ;;  %1838 = vmatprep.subr.mxu1 %v3187_v0  ;;  %v2429_v30 = vld [vmem:[#allocation5 + $0x100] sm:$0xff]  ;;  %v2432_v31 = vld [vmem:[#allocation5 + $0x78] sm:$0xff]  ;;  %v2436_v32 = vld [vmem:[#allocation5 + $0x68] sm:$0xff] }
  0x1e   :  { %110 = vmatpush1.msra.mxu0 %v2366_v10  ;;  %1839 = vmatpush3.msra.mxu1 %v2399_v21  ;;  %v2439_v33 = vld [vmem:[#allocation5 + $0xe8] sm:$0xff]  ;;  %v2442_v34 = vld [vmem:[#allocation5 + $0x60] sm:$0xff]  ;;  %v2446_v35 = vld [vmem:[#allocation5 + $0x50] sm:$0xff]  ;;  %p2290_p9 = pnand %p2289_p8, %p2283_p5 }
  0x1f   :  { %111 = vmatprep.subr.mxu0 %v2369_v11  ;;  %1840 = vmatprep.subr.mxu1 %v3187_v0  ;;  %v2449_v36 = vld [vmem:[#allocation5 + $0xd0] sm:$0xff]  ;;  %v2452_v37 = vld [vmem:[#allocation5 + $0x48] sm:$0xff]  ;;  %v2456_v38 = vld [vmem:[#allocation5 + $0x38] sm:$0xff] }
  0x20   :  { %112 = vmatpush1.msra.mxu0 %v2372_v12  ;;  %1841 = vmatpush3.msra.mxu1 %v2409_v24  ;;  %3216 = vst [vmem:[#allocation13_spill] sm:$0xff] %v2456_v38  ;;  %v2459_v39 = vld [vmem:[#allocation5 + $0xb8] sm:$0xff]  ;;  %v2462_v40 = vld [vmem:[#allocation5 + $0x30] sm:$0xff]  ;;  %v2466_v41 = vld [vmem:[#allocation5 + $0x20] sm:$0xff] }
  0x21   :  { %113 = vmatprep.subr.mxu0 %v2375_v13  ;;  %1842 = vmatprep.subr.mxu1 %v3187_v0  ;;  %3217 = vst [vmem:[#allocation14_spill] sm:$0xff] %v2462_v40  ;;  %3218 = vst [vmem:[#allocation15_spill] sm:$0xff] %v2466_v41  ;;  %v2469_v42 = vld [vmem:[#allocation5 + $0xa0] sm:$0xff]  ;;  %v2472_v43 = vld [vmem:[#allocation5 + $0x18] sm:$0xff] }
  0x22   :  { %114 = vmatpush1.msra.mxu0 %v2380_v15  ;;  %1843 = vmatpush3.msra.mxu1 %v2419_v27  ;;  %3219 = vst [vmem:[#allocation16_spill] sm:$0xff] %v2472_v43  ;;  %v2477_v44 = vld [vmem:[#allocation5 + $0x88] sm:$0xff]  ;;  %v2483_v45 = vld [vmem:[#allocation5 + $0x70] sm:$0xff]  ;;  %v2488_v46 = vld [vmem:[#allocation5 + $0x58] sm:$0xff] }
  0x23   :  { %115 = vmatprep.subr.mxu0 %v2386_v17  ;;  %1844 = vmatprep.subr.mxu1 %v3187_v0  ;;  %v2494_v47 = vld [vmem:[#allocation5 + $0x40] sm:$0xff]  ;;  %v2500_v48 = vld [vmem:[#allocation5 + $0x28] sm:$0xff]  ;;  %v2581_v52 = vld [vmem:[#allocation5 + $0x12] ss:$0 sm:$0xff] }
  0x24   :  { %116 = vmatpush1.msra.mxu0 %v2392_v19  ;;  %1845 = vmatpush3.msra.mxu1 %v2429_v30  ;;  %3220 = vst [vmem:[#allocation17_spill] sm:$0xff] %v2494_v47  ;;  %3221 = vst [vmem:[#allocation18_spill] sm:$0xff] %v2500_v48  ;;  %v2571_v54 = vld [vmem:[#allocation5] ss:$8 sm:$0x7] }
  0x25   :  { %117 = vmatprep.subr.mxu0 %v2396_v20  ;;  %1846 = vmatprep.subr.mxu1 %v3187_v0  ;;  %3222 = vst [vmem:[#allocation19_spill] sm:$0xff] %v2571_v54  ;;  %v99_v57 = vmul.f32 %v98_v55, %v2571_v54  ;;  %v2576_v59 = vld [vmem:[#allocation5 + $0x1] ss:$8 sm:$0x7] }
  0x26   :  { %118 = vmatpush1.msra.mxu0 %v2402_v22  ;;  %1847 = vmatpush3.msra.mxu1 %v2439_v33  ;;  %3224 = vst [vmem:[#allocation21_spill] sm:$0xff] %v2576_v59 }
  0x27   :  { %119 = vmatprep.subr.mxu0 %v2406_v23  ;;  %1848 = vmatprep.subr.mxu1 %v3187_v0  ;;  %v100_v62 = vadd.f32 %v99_v57, %v2576_v59 }
  0x28   :  { %120 = vmatpush1.msra.mxu0 %v2412_v25  ;;  %1849 = vmatpush3.msra.mxu1 %v2449_v36 }
  0x29   :  { %121 = vmatprep.subr.mxu0 %v2416_v26  ;;  %1850 = vmatprep.subr.mxu1 %v3187_v0  ;;  %v270_v55 = vrot.slane %v100_v62, 2 }
  0x2a   :  { %122 = vmatpush1.msra.mxu0 %v2422_v28  ;;  %1851 = vmatpush3.msra.mxu1 %v2459_v39 }
  0x2b   :  { %123 = vmatprep.subr.mxu0 %v2426_v29  ;;  %1852 = vmatprep.subr.mxu1 %v3187_v0 }
  0x2c   :  { %124 = vmatpush1.msra.mxu0 %v2432_v31  ;;  %1853 = vmatpush3.msra.mxu1 %v2469_v42 }
  0x2d   :  { %125 = vmatprep.subr.mxu0 %v2436_v32  ;;  %1854 = vmatprep.subr.mxu1 %v3187_v0 }
  0x2e   :  { %126 = vmatpush1.msra.mxu0 %v2442_v34  ;;  %1855 = vmatpush3.msra.mxu1 %v2477_v44 }
  0x2f   :  { %127 = vmatprep.subr.mxu0 %v2446_v35  ;;  %1856 = vmatprep.subr.mxu1 %v3187_v0 }
  0x30   :  { %128 = vmatpush1.msra.mxu0 %v2452_v37  ;;  %1857 = vmatpush3.msra.mxu1 %v2483_v45 }
  0x31   :  { %129 = vmatprep.subr.mxu0 %v2456_v38  ;;  %1858 = vmatprep.subr.mxu1 %v3187_v0 }
  0x32   :  { %130 = vmatpush1.msra.mxu0 %v2462_v40  ;;  %1859 = vmatpush3.msra.mxu1 %v2488_v46 }
  0x33   :  { %131 = vmatprep.subr.mxu0 %v2466_v41  ;;  %1860 = vmatprep.subr.mxu1 %v3187_v0 }
  0x34   :  { %132 = vmatpush1.msra.mxu0 %v2472_v43  ;;  %1861 = vmatpush3.msra.mxu1 %v2494_v47 }
  0x35   :  { %166 = vmatmul.mubr.f32.vlgmr.msra.gmra.mxu0 %v3187_v0  ;;  %286 = vmatprep.subr.mxu0 %v2341_v1 }
  0x36   :  { %287 = vmatpush1.msra.mxu0 %v2343_v2  ;;  %1862 = vmatprep.subr.mxu1 %v3187_v0 }
  0x37   :  { %288 = vmatprep.subr.mxu0 %v2345_v3  ;;  %1863 = vmatpush3.msra.mxu1 %v2500_v48 }
  0x38   :  { %289 = vmatpush1.msra.mxu0 %v2348_v4  ;;  %1865 = vmatmul.mubr.f32.vlgmr.msra.gmra.mxu1 %v3187_v0 }
  0x39   :  { %290 = vmatprep.subr.mxu0 %v2351_v5  ;;  %1867 = vmatprep.subr.mxu1 %v3187_v0 }
  0x3a   :  { %291 = vmatpush1.msra.mxu0 %v2354_v6  ;;  %1868 = vmatpush3.msra.mxu1 %v2377_v14 }
  0x3b   :  { %292 = vmatprep.subr.mxu0 %v2357_v7  ;;  %1869 = vmatprep.subr.mxu1 %v3187_v0 }
  0x3c   :  { %293 = vmatpush1.msra.mxu0 %v2360_v8  ;;  %1870 = vmatpush3.msra.mxu1 %v2383_v16 }
  0x3d   :  { %294 = vmatprep.subr.mxu0 %v2363_v9  ;;  %1871 = vmatprep.subr.mxu1 %v3187_v0 }
  0x3e   :  { %295 = vmatpush1.msra.mxu0 %v2366_v10  ;;  %1872 = vmatpush3.msra.mxu1 %v2389_v18 }
  0x3f   :  { %296 = vmatprep.subr.mxu0 %v2369_v11  ;;  %1873 = vmatprep.subr.mxu1 %v3187_v0 }
  0x40   :  { %297 = vmatpush1.msra.mxu0 %v2372_v12  ;;  %1874 = vmatpush3.msra.mxu1 %v2399_v21 }
  0x41   :  { %298 = vmatprep.subr.mxu0 %v2375_v13  ;;  %1875 = vmatprep.subr.mxu1 %v3187_v0 }
  0x42   :  { %299 = vmatpush1.msra.mxu0 %v2380_v15  ;;  %1876 = vmatpush3.msra.mxu1 %v2409_v24 }
  0x43   :  { %300 = vmatprep.subr.mxu0 %v2386_v17  ;;  %1877 = vmatprep.subr.mxu1 %v3187_v0 }
  0x44   :  { %301 = vmatpush1.msra.mxu0 %v2392_v19  ;;  %1878 = vmatpush3.msra.mxu1 %v2419_v27 }
  0x45   :  { %302 = vmatprep.subr.mxu0 %v2396_v20  ;;  %1879 = vmatprep.subr.mxu1 %v3187_v0 }
  0x46   :  { %303 = vmatpush1.msra.mxu0 %v2402_v22  ;;  %1880 = vmatpush3.msra.mxu1 %v2429_v30 }
  0x47   :  { %304 = vmatprep.subr.mxu0 %v2406_v23  ;;  %1881 = vmatprep.subr.mxu1 %v3187_v0 }
  0x48   :  { %305 = vmatpush1.msra.mxu0 %v2412_v25  ;;  %1882 = vmatpush3.msra.mxu1 %v2439_v33 }
  0x49   :  { %306 = vmatprep.subr.mxu0 %v2416_v26  ;;  %1883 = vmatprep.subr.mxu1 %v3187_v0 }
  0x4a   :  { %307 = vmatpush1.msra.mxu0 %v2422_v28  ;;  %1884 = vmatpush3.msra.mxu1 %v2449_v36 }
  0x4b   :  { %308 = vmatprep.subr.mxu0 %v2426_v29  ;;  %1885 = vmatprep.subr.mxu1 %v3187_v0 }
  0x4c   :  { %309 = vmatpush1.msra.mxu0 %v2432_v31  ;;  %1886 = vmatpush3.msra.mxu1 %v2459_v39 }
  0x4d   :  { %310 = vmatprep.subr.mxu0 %v2436_v32  ;;  %1887 = vmatprep.subr.mxu1 %v3187_v0 }
  0x4e   :  { %311 = vmatpush1.msra.mxu0 %v2442_v34  ;;  %1888 = vmatpush3.msra.mxu1 %v2469_v42 }
  0x4f   :  { %312 = vmatprep.subr.mxu0 %v2446_v35  ;;  %1889 = vmatprep.subr.mxu1 %v3187_v0 }
  0x50   :  { %313 = vmatpush1.msra.mxu0 %v2452_v37  ;;  %1890 = vmatpush3.msra.mxu1 %v2477_v44 }
  0x51   :  { %314 = vmatprep.subr.mxu0 %v2456_v38  ;;  %1891 = vmatprep.subr.mxu1 %v3187_v0 }
  0x52   :  { %315 = vmatpush1.msra.mxu0 %v2462_v40  ;;  %1892 = vmatpush3.msra.mxu1 %v2483_v45 }
  0x53   :  { %316 = vmatprep.subr.mxu0 %v2466_v41  ;;  %350 = vmatprep.mubr.f32.mxu0 %v3187_v0 }
  0x54   :  { %317 = vmatpush1.msra.mxu0 %v2472_v43  ;;  %1893 = vmatprep.subr.mxu1 %v3187_v0 }
  0x55   :  { %1899 = vmatprep.mubr.msk.f32.mxu1 %vm2313_vm0, %v3187_v0  ;;  %1894 = vmatpush3.msra.mxu1 %v2488_v46 }
  0x56   :  { %471 = vmatprep.subr.mxu0 %v2341_v1  ;;  %1895 = vmatprep.subr.mxu1 %v3187_v0 }
  0x57   :  { %1896 = vmatpush3.msra.mxu1 %v2494_v47 }
  0x58   :  { %1897 = vmatprep.subr.mxu1 %v3187_v0 }
  0x59   :  { %1898 = vmatpush3.msra.mxu1 %v2500_v48 }
  0x5a   :  { %1902 = vmatprep.subr.mxu1 %v3187_v0 }
  0xf5   :  { %v167_v56 = vpop.f32.mrf.mxu0 }
  0xf7   :  { %v169_v60 = vpop.f32.mrf.mxu0 }
  0xf8   :  { %v244_v61 = vcombine.low %v167_v56, %v169_v60  ;;  %v238_v51 = vpop.f32.mrf.mxu1 }
  0xf9   :  { %v267_v53 = vadd.f32 %v238_v51, %v2581_v52 }
  0xfa   :  { %v251_v63 = vrot.slane %v244_v61, %v2574_v58  ;;  %v1866_v1 = vpop.f32.mrf.mxu1 }
  0xfb   :  { %v3226_v1 = vld [vmem:[#allocation16_spill] sm:$0xff] }
  0xfc   :  { %v258_v49 = vrot.slane %v251_v63, %v2574_v58 }
  0xfe   :  { %v260_v50 = vadd.f32 %v258_v49, %v100_v62 }
 0x100   :  { %v1664_v0 = vmul.f32 -1.442695, %v260_v50 }
 0x102   :  { %2155 = vpow2.f32 %v1664_v0  ;;  %v3225_v0 = vmov 0.0  }
 0x10f   :  { %v2156_v48 = vpop.eup %2155 }
 0x110   :  { %v264_v43 = vadd.f32 1.0, %v2156_v48  ;;  %v3228_v48 = vld [vmem:[#allocation12_spill] sm:$0xff] }
 0x112   :  { %2157 = vrcp.f32 %v264_v43  ;;  %v3227_v43 = vld [vmem:[#allocation18_spill] sm:$0xff] }
 0x11f   :  { %v2158_v56 = vpop.eup %2157 }
 0x120   :  { %v268_v60 = vmul.f32 %v2158_v56, %v267_v53  ;;  %v275_v61 = vrot.slane %v2158_v56, 1 }
 0x122   :  { %v272_v57 = vadd.f32 %v270_v55, %v268_v60  ;;  %v277_v59 = vsub.f32 1.0, %v275_v61  ;;  %v279_v58 = vmul.f32 0.0, %v275_v61  ;;  %v3229_v60 = vld [vmem:[#allocation21_spill] sm:$0xff]  ;;  %v3230_v61 = vld [vmem:[#allocation20_spill] sm:$0xff] }
 0x124   :  { %2159 = vtanh.f32 %v272_v57 }
 0x131   :  { %v2160_v63 = vpop.eup %2159 }
 0x132   :  { %v278_v49 = vmul.f32 %v2160_v63, %v277_v59 }
 0x134   :  { %v2584_v50 = vadd.f32 %v279_v58, %v278_v49  ;;  %v283_v58 = vstv %s1665_s1 }
 0x135   :  { %v284_v51 = vmul.f32 %v283_v58, %v2571_v54 }
 0x136   :  { %281 = vst [vmem:[#allocation2] sm:$0x1] %v2584_v50  ;;  %351 = vmatmul.mubr.f32.vlgmr.msra.gmra.mxu0 %v2584_v50  ;;  %1900 = vmatmul.mubr.f32.vlgmr.msra.gmra.mxu1 %v2584_v50 }
 0x137   :  { %472 = vmatpush1.msra.mxu0 %v2343_v2  ;;  %1903 = vmatpush3.msra.mxu1 %v2377_v14  ;;  %v285_v57 = vadd.f32 %v284_v51, %v3229_v60 }
 0x138   :  { %473 = vmatprep.subr.mxu0 %v2345_v3  ;;  %1904 = vmatprep.subr.mxu1 %v3225_v0 }
 0x139   :  { %474 = vmatpush1.msra.mxu0 %v2348_v4  ;;  %1905 = vmatpush3.msra.mxu1 %v2383_v16 }
 0x13a   :  { %475 = vmatprep.subr.mxu0 %v2351_v5  ;;  %1906 = vmatprep.subr.mxu1 %v3225_v0 }
 0x13b   :  { %476 = vmatpush1.msra.mxu0 %v2354_v6  ;;  %1907 = vmatpush3.msra.mxu1 %v2389_v18 }
 0x13c   :  { %477 = vmatprep.subr.mxu0 %v2357_v7  ;;  %1908 = vmatprep.subr.mxu1 %v3225_v0 }
 0x13d   :  { %478 = vmatpush1.msra.mxu0 %v2360_v8  ;;  %1909 = vmatpush3.msra.mxu1 %v2399_v21 }
 0x13e   :  { %479 = vmatprep.subr.mxu0 %v2363_v9  ;;  %1910 = vmatprep.subr.mxu1 %v3225_v0 }
 0x13f   :  { %480 = vmatpush1.msra.mxu0 %v2366_v10  ;;  %1911 = vmatpush3.msra.mxu1 %v2409_v24 }
 0x140   :  { %481 = vmatprep.subr.mxu0 %v2369_v11  ;;  %1912 = vmatprep.subr.mxu1 %v3225_v0 }
 0x141   :  { %482 = vmatpush1.msra.mxu0 %v2372_v12  ;;  %1913 = vmatpush3.msra.mxu1 %v2419_v27 }
 0x142   :  { %483 = vmatprep.subr.mxu0 %v2375_v13  ;;  %1914 = vmatprep.subr.mxu1 %v3225_v0 }
 0x143   :  { %484 = vmatpush1.msra.mxu0 %v2380_v15  ;;  %1915 = vmatpush3.msra.mxu1 %v2429_v30 }
 0x144   :  { %485 = vmatprep.subr.mxu0 %v2386_v17  ;;  %1916 = vmatprep.subr.mxu1 %v3225_v0 }
 0x145   :  { %486 = vmatpush1.msra.mxu0 %v2392_v19  ;;  %1917 = vmatpush3.msra.mxu1 %v2439_v33 }
 0x146   :  { %487 = vmatprep.subr.mxu0 %v2396_v20  ;;  %1918 = vmatprep.subr.mxu1 %v3225_v0 }
 0x147   :  { %488 = vmatpush1.msra.mxu0 %v2402_v22  ;;  %1919 = vmatpush3.msra.mxu1 %v2449_v36 }
 0x148   :  { %489 = vmatprep.subr.mxu0 %v2406_v23  ;;  %1920 = vmatprep.subr.mxu1 %v3225_v0 }
 0x149   :  { %490 = vmatpush1.msra.mxu0 %v2412_v25  ;;  %1921 = vmatpush3.msra.mxu1 %v2459_v39 }
 0x14a   :  { %491 = vmatprep.subr.mxu0 %v2416_v26  ;;  %1922 = vmatprep.subr.mxu1 %v3225_v0 }
 0x14b   :  { %492 = vmatpush1.msra.mxu0 %v2422_v28  ;;  %1923 = vmatpush3.msra.mxu1 %v2469_v42 }
 0x14c   :  { %493 = vmatprep.subr.mxu0 %v2426_v29  ;;  %1924 = vmatprep.subr.mxu1 %v3225_v0 }
 0x14d   :  { %494 = vmatpush1.msra.mxu0 %v2432_v31  ;;  %1925 = vmatpush3.msra.mxu1 %v2477_v44 }
 0x14e   :  { %495 = vmatprep.subr.mxu0 %v2436_v32  ;;  %1926 = vmatprep.subr.mxu1 %v3225_v0 }
 0x14f   :  { %496 = vmatpush1.msra.mxu0 %v2442_v34  ;;  %1927 = vmatpush3.msra.mxu1 %v2483_v45 }
 0x150   :  { %497 = vmatprep.subr.mxu0 %v2446_v35  ;;  %1928 = vmatprep.subr.mxu1 %v3225_v0 }
 0x151   :  { %498 = vmatpush1.msra.mxu0 %v2452_v37  ;;  %1929 = vmatpush3.msra.mxu1 %v2488_v46 }
 0x152   :  { %499 = vmatprep.subr.mxu0 %v2456_v38  ;;  %1930 = vmatprep.subr.mxu1 %v3225_v0 }
 0x153   :  { %500 = vmatpush1.msra.mxu0 %v2462_v40  ;;  %1931 = vmatpush3.msra.mxu1 %v2494_v47  ;;  %v455_v40 = vrot.slane %v285_v57, 2 }
 0x154   :  { %501 = vmatprep.subr.mxu0 %v2466_v41  ;;  %1932 = vmatprep.subr.mxu1 %v3225_v0 }
 0x155   :  { %502 = vmatpush1.msra.mxu0 %v3226_v1  ;;  %535 = vmatprep.mubr.f32.mxu0 %v3225_v0 }
 0x156   :  { %1933 = vmatpush3.msra.mxu1 %v3227_v43  ;;  %1934 = vmatprep.mubr.msk.f32.mxu1 %vm2313_vm0, %v3225_v0 }
 0x157   :  { %656 = vmatprep.subr.mxu0 %v3228_v48  ;;  %1937 = vmatprep.subr.mxu1 %v3225_v0 }
 0x1f6   :  { %v352_v59 = vpop.f32.mrf.mxu0  ;;  %v423_v62 = vpop.f32.mrf.mxu1 }
 0x1f7   :  { %v452_v47 = vadd.f32 %v423_v62, %v2581_v52 }
 0x1f8   :  { %v354_v53 = vpop.f32.mrf.mxu0  ;;  %v1901_v55 = vpop.f32.mrf.mxu1 }
 0x1f9   :  { %v429_v56 = vcombine.low %v352_v59, %v354_v53 }
 0x1fb   :  { %v436_v63 = vrot.slane %v429_v56, %v3230_v61 }
 0x1fd   :  { %v443_v49 = vrot.slane %v436_v63, %v3230_v61 }
 0x1ff   :  { %v445_v43 = vadd.f32 %v443_v49, %v285_v57  ;;  %v3238_v57 = vld [vmem:[#allocation19_spill] sm:$0xff] }
 0x201   :  { %v1666_v1 = vmul.f32 -1.442695, %v445_v43  ;;  %v468_v43 = vstv %s1667_s19 }
 0x202   :  { %v469_v49 = vmul.f32 %v468_v43, %v3238_v57 }
 0x203   :  { %2161 = vpow2.f32 %v1666_v1  ;;  %v3237_v1 = vld [vmem:[#allocation12_spill] sm:$0xff] }
 0x210   :  { %v2162_v48 = vpop.eup %2161 }
 0x211   :  { %v449_v41 = vadd.f32 1.0, %v2162_v48 }
 0x213   :  { %2163 = vrcp.f32 %v449_v41  ;;  %v3233_v41 = vld [vmem:[#allocation17_spill] sm:$0xff] }
 0x220   :  { %v2164_v38 = vpop.eup %2163 }
 0x221   :  { %v453_v58 = vmul.f32 %v2164_v38, %v452_v47  ;;  %v460_v59 = vrot.slane %v2164_v38, 1  ;;  %v3231_v38 = vld [vmem:[#allocation13_spill] sm:$0xff]  ;;  %v3234_v47 = vld [vmem:[#allocation15_spill] sm:$0xff] }
 0x223   :  { %v457_v54 = vadd.f32 %v455_v40, %v453_v58  ;;  %v462_v53 = vsub.f32 1.0, %v460_v59  ;;  %v464_v56 = vmul.f32 %v460_v59, %v2584_v50  ;;  %v3232_v40 = vld [vmem:[#allocation14_spill] sm:$0xff] }
 0x224   :  { %v3236_v50 = vld [vmem:[#allocation18_spill] sm:$0xff] }
 0x225   :  { %2165 = vtanh.f32 %v457_v54  ;;  %v3235_v54 = vld [vmem:[#allocation16_spill] sm:$0xff] }
 0x232   :  { %v2166_v51 = vpop.eup %2165 }
 0x233   :  { %v463_v55 = vmul.f32 %v2166_v51, %v462_v53  ;;  %v470_v51 = vadd.f32 %v469_v49, %v3229_v60 }
 0x235   :  { %v2662_v63 = vadd.f32 %v464_v56, %v463_v55 }
 0x237   :  { %466 = vst [vmem:[#allocation2 + $0x1] sm:$0x1] %v2662_v63  ;;  %536 = vmatmul.mubr.f32.vlgmr.msra.gmra.mxu0 %v2662_v63  ;;  %1935 = vmatmul.mubr.f32.vlgmr.msra.gmra.mxu1 %v2662_v63 }
 0x238   :  { %657 = vmatpush1.msra.mxu0 %v2343_v2  ;;  %1938 = vmatpush3.msra.mxu1 %v2377_v14 }
 0x239   :  { %658 = vmatprep.subr.mxu0 %v2345_v3  ;;  %1939 = vmatprep.subr.mxu1 %v3225_v0 }
 0x23a   :  { %659 = vmatpush1.msra.mxu0 %v2348_v4  ;;  %1940 = vmatpush3.msra.mxu1 %v2383_v16 }
 0x23b   :  { %660 = vmatprep.subr.mxu0 %v2351_v5  ;;  %1941 = vmatprep.subr.mxu1 %v3225_v0 }
 0x23c   :  { %661 = vmatpush1.msra.mxu0 %v2354_v6  ;;  %1942 = vmatpush3.msra.mxu1 %v2389_v18 }
 0x23d   :  { %662 = vmatprep.subr.mxu0 %v2357_v7  ;;  %1943 = vmatprep.subr.mxu1 %v3225_v0 }
 0x23e   :  { %663 = vmatpush1.msra.mxu0 %v2360_v8  ;;  %1944 = vmatpush3.msra.mxu1 %v2399_v21 }
 0x23f   :  { %664 = vmatprep.subr.mxu0 %v2363_v9  ;;  %1945 = vmatprep.subr.mxu1 %v3225_v0 }
 0x240   :  { %665 = vmatpush1.msra.mxu0 %v2366_v10  ;;  %1946 = vmatpush3.msra.mxu1 %v2409_v24 }
 0x241   :  { %666 = vmatprep.subr.mxu0 %v2369_v11  ;;  %1947 = vmatprep.subr.mxu1 %v3225_v0 }
 0x242   :  { %667 = vmatpush1.msra.mxu0 %v2372_v12  ;;  %1948 = vmatpush3.msra.mxu1 %v2419_v27 }
 0x243   :  { %668 = vmatprep.subr.mxu0 %v2375_v13  ;;  %1949 = vmatprep.subr.mxu1 %v3225_v0 }
 0x244   :  { %669 = vmatpush1.msra.mxu0 %v2380_v15  ;;  %1950 = vmatpush3.msra.mxu1 %v2429_v30 }
 0x245   :  { %670 = vmatprep.subr.mxu0 %v2386_v17  ;;  %1951 = vmatprep.subr.mxu1 %v3225_v0 }
 0x246   :  { %671 = vmatpush1.msra.mxu0 %v2392_v19  ;;  %1952 = vmatpush3.msra.mxu1 %v2439_v33 }
 0x247   :  { %672 = vmatprep.subr.mxu0 %v2396_v20  ;;  %1953 = vmatprep.subr.mxu1 %v3225_v0 }
 0x248   :  { %673 = vmatpush1.msra.mxu0 %v2402_v22  ;;  %1954 = vmatpush3.msra.mxu1 %v2449_v36 }
 0x249   :  { %674 = vmatprep.subr.mxu0 %v2406_v23  ;;  %1955 = vmatprep.subr.mxu1 %v3225_v0 }
 0x24a   :  { %675 = vmatpush1.msra.mxu0 %v2412_v25  ;;  %1956 = vmatpush3.msra.mxu1 %v2459_v39 }
 0x24b   :  { %676 = vmatprep.subr.mxu0 %v2416_v26  ;;  %1957 = vmatprep.subr.mxu1 %v3225_v0 }
 0x24c   :  { %677 = vmatpush1.msra.mxu0 %v2422_v28  ;;  %1958 = vmatpush3.msra.mxu1 %v2469_v42 }
 0x24d   :  { %678 = vmatprep.subr.mxu0 %v2426_v29  ;;  %1959 = vmatprep.subr.mxu1 %v3225_v0 }
 0x24e   :  { %679 = vmatpush1.msra.mxu0 %v2432_v31  ;;  %1960 = vmatpush3.msra.mxu1 %v2477_v44 }
 0x24f   :  { %680 = vmatprep.subr.mxu0 %v2436_v32  ;;  %1961 = vmatprep.subr.mxu1 %v3225_v0 }
 0x250   :  { %681 = vmatpush1.msra.mxu0 %v2442_v34  ;;  %1962 = vmatpush3.msra.mxu1 %v2483_v45 }
 0x251   :  { %682 = vmatprep.subr.mxu0 %v2446_v35  ;;  %1963 = vmatprep.subr.mxu1 %v3225_v0 }
 0x252   :  { %683 = vmatpush1.msra.mxu0 %v2452_v37  ;;  %1964 = vmatpush3.msra.mxu1 %v2488_v46 }
 0x253   :  { %684 = vmatprep.subr.mxu0 %v3231_v38  ;;  %1965 = vmatprep.subr.mxu1 %v3225_v0 }
 0x254   :  { %685 = vmatpush1.msra.mxu0 %v3232_v40  ;;  %1966 = vmatpush3.msra.mxu1 %v3233_v41  ;;  %v640_v40 = vrot.slane %v470_v51, 2 }
 0x255   :  { %686 = vmatprep.subr.mxu0 %v3234_v47  ;;  %1967 = vmatprep.subr.mxu1 %v3225_v0 }
 0x256   :  { %687 = vmatpush1.msra.mxu0 %v3235_v54  ;;  %720 = vmatprep.mubr.f32.mxu0 %v3225_v0 }
 0x257   :  { %1968 = vmatpush3.msra.mxu1 %v3236_v50  ;;  %1969 = vmatprep.mubr.msk.f32.mxu1 %vm2313_vm0, %v3225_v0 }
 0x258   :  { %841 = vmatprep.subr.mxu0 %v3237_v1  ;;  %1972 = vmatprep.subr.mxu1 %v3225_v0 }
 0x2f7   :  { %v537_v48 = vpop.f32.mrf.mxu0  ;;  %v608_v62 = vpop.f32.mrf.mxu1 }
 0x2f8   :  { %v637_v41 = vadd.f32 %v608_v62, %v2581_v52 }
 0x2f9   :  { %v539_v58 = vpop.f32.mrf.mxu0  ;;  %v1936_v59 = vpop.f32.mrf.mxu1 }
 0x2fa   :  { %v614_v53 = vcombine.low %v537_v48, %v539_v58 }
 0x2fc   :  { %v621_v55 = vrot.slane %v614_v53, %v3230_v61 }
 0x2fe   :  { %v628_v56 = vrot.slane %v621_v55, %v3230_v61 }
 0x300   :  { %v630_v50 = vadd.f32 %v628_v56, %v470_v51 }
 0x302   :  { %v1668_v54 = vmul.f32 -1.442695, %v630_v50 }
 0x304   :  { %2167 = vpow2.f32 %v1668_v54 }
 0x311   :  { %v2168_v1 = vpop.eup %2167 }
 0x312   :  { %v634_v47 = vadd.f32 1.0, %v2168_v1 }
 0x314   :  { %2169 = vrcp.f32 %v634_v47 }
 0x321   :  { %v2170_v38 = vpop.eup %2169 }
 0x322   :  { %v638_v43 = vmul.f32 %v2170_v38, %v637_v41  ;;  %v645_v48 = vrot.slane %v2170_v38, 1 }
 0x324   :  { %v642_v57 = vadd.f32 %v640_v40, %v638_v43  ;;  %v647_v58 = vsub.f32 1.0, %v645_v48  ;;  %v649_v53 = vmul.f32 %v645_v48, %v2662_v63 }
 0x326   :  { %2171 = vtanh.f32 %v642_v57 }
 0x333   :  { %v2172_v49 = vpop.eup %2171 }
 0x334   :  { %v648_v59 = vmul.f32 %v2172_v49, %v647_v58 }
 0x336   :  { %v2740_v55 = vadd.f32 %v649_v53, %v648_v59 }
 0x338   :  { %651 = vst [vmem:[#allocation2 + $0x2] sm:$0x1] %v2740_v55  ;;  %721 = vmatmul.mubr.f32.vlgmr.msra.gmra.mxu0 %v2740_v55  ;;  %1970 = vmatmul.mubr.f32.vlgmr.msra.gmra.mxu1 %v2740_v55 }
 0x339   :  { %842 = vmatpush1.msra.mxu0 %v2343_v2  ;;  %1973 = vmatpush3.msra.mxu1 %v2377_v14  ;;  %v3239_v2 = vld [vmem:[#allocation13_spill] sm:$0xff] }
 0x33a   :  { %843 = vmatprep.subr.mxu0 %v2345_v3  ;;  %1974 = vmatprep.subr.mxu1 %v3225_v0  ;;  %v3240_v3 = vld [vmem:[#allocation14_spill] sm:$0xff] }
 0x33b   :  { %844 = vmatpush1.msra.mxu0 %v2348_v4  ;;  %1975 = vmatpush3.msra.mxu1 %v2383_v16  ;;  %v3241_v4 = vld [vmem:[#allocation17_spill] sm:$0xff] }
 0x33c   :  { %845 = vmatprep.subr.mxu0 %v2351_v5  ;;  %1976 = vmatprep.subr.mxu1 %v3225_v0  ;;  %v3242_v5 = vld [vmem:[#allocation15_spill] sm:$0xff] }
 0x33d   :  { %846 = vmatpush1.msra.mxu0 %v2354_v6  ;;  %1977 = vmatpush3.msra.mxu1 %v2389_v18  ;;  %v3243_v6 = vld [vmem:[#allocation16_spill] sm:$0xff] }
 0x33e   :  { %847 = vmatprep.subr.mxu0 %v2357_v7  ;;  %1978 = vmatprep.subr.mxu1 %v3225_v0  ;;  %v3244_v7 = vld [vmem:[#allocation18_spill] sm:$0xff] }
 0x33f   :  { %848 = vmatpush1.msra.mxu0 %v2360_v8  ;;  %1979 = vmatpush3.msra.mxu1 %v2399_v21  ;;  %v3245_v8 = vld [vmem:[#allocation12_spill] sm:$0xff] }
 0x340   :  { %849 = vmatprep.subr.mxu0 %v2363_v9  ;;  %1980 = vmatprep.subr.mxu1 %v3225_v0  ;;  %v653_v9 = vstv %s1669_s20 }
 0x341   :  { %850 = vmatpush1.msra.mxu0 %v2366_v10  ;;  %1981 = vmatpush3.msra.mxu1 %v2409_v24 }
 0x342   :  { %851 = vmatprep.subr.mxu0 %v2369_v11  ;;  %1982 = vmatprep.subr.mxu1 %v3225_v0 }
 0x343   :  { %852 = vmatpush1.msra.mxu0 %v2372_v12  ;;  %1983 = vmatpush3.msra.mxu1 %v2419_v27  ;;  %v3246_v12 = vld [vmem:[#allocation19_spill] sm:$0xff] }
 0x344   :  { %853 = vmatprep.subr.mxu0 %v2375_v13  ;;  %1984 = vmatprep.subr.mxu1 %v3225_v0  ;;  %v654_v13 = vmul.f32 %v653_v9, %v3246_v12  ;;  %v2823_v9 = vld [vmem:[#allocation5 + $0x180] sm:$0xff] }
 0x345   :  { %854 = vmatpush1.msra.mxu0 %v2380_v15  ;;  %1985 = vmatpush3.msra.mxu1 %v2429_v30 }
 0x346   :  { %855 = vmatprep.subr.mxu0 %v2386_v17  ;;  %1986 = vmatprep.subr.mxu1 %v3225_v0  ;;  %v655_v38 = vadd.f32 %v654_v13, %v3229_v60  ;;  %v2839_v13 = vld [vmem:[#allocation5 + $0x150] sm:$0xff] }
 0x347   :  { %856 = vmatpush1.msra.mxu0 %v2392_v19  ;;  %1987 = vmatpush3.msra.mxu1 %v2439_v33 }
 0x348   :  { %857 = vmatprep.subr.mxu0 %v2396_v20  ;;  %1988 = vmatprep.subr.mxu1 %v3225_v0  ;;  %v825_v57 = vrot.slane %v655_v38, 2 }
 0x349   :  { %858 = vmatpush1.msra.mxu0 %v2402_v22  ;;  %1989 = vmatpush3.msra.mxu1 %v2449_v36 }
 0x34a   :  { %859 = vmatprep.subr.mxu0 %v2406_v23  ;;  %1990 = vmatprep.subr.mxu1 %v3225_v0 }
 0x34b   :  { %860 = vmatpush1.msra.mxu0 %v2412_v25  ;;  %1991 = vmatpush3.msra.mxu1 %v2459_v39 }
 0x34c   :  { %861 = vmatprep.subr.mxu0 %v2416_v26  ;;  %1992 = vmatprep.subr.mxu1 %v3225_v0 }
 0x34d   :  { %862 = vmatpush1.msra.mxu0 %v2422_v28  ;;  %1993 = vmatpush3.msra.mxu1 %v2469_v42 }
 0x34e   :  { %863 = vmatprep.subr.mxu0 %v2426_v29  ;;  %1994 = vmatprep.subr.mxu1 %v3225_v0 }
 0x34f   :  { %864 = vmatpush1.msra.mxu0 %v2432_v31  ;;  %1995 = vmatpush3.msra.mxu1 %v2477_v44 }
 0x350   :  { %865 = vmatprep.subr.mxu0 %v2436_v32  ;;  %1996 = vmatprep.subr.mxu1 %v3225_v0 }
 0x351   :  { %866 = vmatpush1.msra.mxu0 %v2442_v34  ;;  %1997 = vmatpush3.msra.mxu1 %v2483_v45 }
 0x352   :  { %867 = vmatprep.subr.mxu0 %v2446_v35  ;;  %1998 = vmatprep.subr.mxu1 %v3225_v0 }
 0x353   :  { %868 = vmatpush1.msra.mxu0 %v2452_v37  ;;  %1999 = vmatpush3.msra.mxu1 %v2488_v46 }
 0x354   :  { %869 = vmatprep.subr.mxu0 %v3239_v2  ;;  %2000 = vmatprep.subr.mxu1 %v3225_v0 }
 0x355   :  { %870 = vmatpush1.msra.mxu0 %v3240_v3  ;;  %2001 = vmatpush3.msra.mxu1 %v3241_v4 }
 0x356   :  { %871 = vmatprep.subr.mxu0 %v3242_v5  ;;  %2002 = vmatprep.subr.mxu1 %v3225_v0 }
 0x357   :  { %872 = vmatpush1.msra.mxu0 %v3243_v6  ;;  %905 = vmatprep.mubr.f32.mxu0 %v3225_v0 }
 0x358   :  { %2003 = vmatpush3.msra.mxu1 %v3244_v7  ;;  %2004 = vmatprep.mubr.msk.f32.mxu1 %vm2313_vm0, %v3225_v0 }
 0x359   :  { %1026 = vmatprep.subr.mxu0 %v3245_v8  ;;  %2007 = vmatprep.subr.mxu1 %v3225_v0 }
 0x3f8   :  { %v722_v10 = vpop.f32.mrf.mxu0  ;;  %v793_v11 = vpop.f32.mrf.mxu1 }
 0x3f9   :  { %v822_v62 = vadd.f32 %v793_v11, %v2581_v52  ;;  %v2835_v11 = vld [vmem:[#allocation5 + $0x158] sm:$0xff] }
 0x3fa   :  { %v724_v15 = vpop.f32.mrf.mxu0  ;;  %v1971_v17 = vpop.f32.mrf.mxu1 }
 0x3fb   :  { %v799_v63 = vcombine.low %v722_v10, %v724_v15  ;;  %v2827_v10 = vld [vmem:[#allocation5 + $0x170] sm:$0xff]  ;;  %v2847_v15 = vld [vmem:[#allocation5 + $0x138] sm:$0xff]  ;;  %v2855_v17 = vld [vmem:[#allocation5 + $0x120] sm:$0xff] }
 0x3fd   :  { %v806_v40 = vrot.slane %v799_v63, %v3230_v61  ;;  %v2863_v63 = vld [vmem:[#allocation5 + $0x108] sm:$0xff] }
 0x3ff   :  { %v813_v41 = vrot.slane %v806_v40, %v3230_v61  ;;  %v2944_v40 = vld [vmem:[#allocation5 + $0x160] sm:$0xff] }
 0x401   :  { %v815_v47 = vadd.f32 %v813_v41, %v655_v38  ;;  %v2871_v38 = vld [vmem:[#allocation5 + $0xf0] sm:$0xff]  ;;  %v2950_v41 = vld [vmem:[#allocation5 + $0x148] sm:$0xff] }
 0x403   :  { %v1670_v54 = vmul.f32 -1.442695, %v815_v47  ;;  %v2956_v47 = vld [vmem:[#allocation5 + $0x130] sm:$0xff] }
 0x405   :  { %2173 = vpow2.f32 %v1670_v54  ;;  %v2962_v54 = vld [vmem:[#allocation5 + $0x118] sm:$0xff] }
 0x412   :  { %v2174_v50 = vpop.eup %2173 }
 0x413   :  { %v819_v1 = vadd.f32 1.0, %v2174_v50  ;;  %v2968_v50 = vld [vmem:[#allocation5 + $0x100] sm:$0xff] }
 0x415   :  { %2175 = vrcp.f32 %v819_v1  ;;  %v2973_v1 = vld [vmem:[#allocation5 + $0xd8] sm:$0xff] }
 0x422   :  { %v2176_v51 = vpop.eup %2175 }
 0x423   :  { %v823_v56 = vmul.f32 %v2176_v51, %v822_v62  ;;  %v830_v48 = vrot.slane %v2176_v51, 1  ;;  %v2976_v62 = vld [vmem:[#allocation5 + $0xe8] sm:$0xff]  ;;  %v2983_v51 = vld [vmem:[#allocation5 + $0xc0] sm:$0xff] }
 0x425   :  { %v827_v43 = vadd.f32 %v825_v57, %v823_v56  ;;  %v832_v58 = vsub.f32 1.0, %v830_v48  ;;  %v834_v53 = vmul.f32 %v830_v48, %v2740_v55  ;;  %v2831_v55 = vld [vmem:[#allocation5 + $0x168] sm:$0xff]  ;;  %v2986_v56 = vld [vmem:[#allocation5 + $0xd0] sm:$0xff] }
 0x426   :  { %v2979_v57 = vld [vmem:[#allocation5 + $0xc8] sm:$0xff] }
 0x427   :  { %2177 = vtanh.f32 %v827_v43  ;;  %v2989_v43 = vld [vmem:[#allocation5 + $0xb0] sm:$0xff]  ;;  %v2993_v48 = vld [vmem:[#allocation5 + $0xa8] sm:$0xff] }
 0x434   :  { %v2178_v49 = vpop.eup %2177 }
 0x435   :  { %v833_v59 = vmul.f32 %v2178_v49, %v832_v58  ;;  %v2996_v58 = vld [vmem:[#allocation5 + $0xb8] sm:$0xff] }
 0x436   :  { %v2999_v49 = vld [vmem:[#allocation5 + $0x98] sm:$0xff] }
 0x437   :  { %v2818_v8 = vadd.f32 %v834_v53, %v833_v59  ;;  %v3003_v59 = vld [vmem:[#allocation5 + $0x90] sm:$0xff]  ;;  %v3006_v53 = vld [vmem:[#allocation5 + $0xa0] sm:$0xff] }
 0x439   :  { %836 = vst [vmem:[#allocation2 + $0x3] sm:$0x1] %v2818_v8  ;;  %906 = vmatmul.mubr.f32.vlgmr.msra.gmra.mxu0 %v2818_v8  ;;  %2005 = vmatmul.mubr.f32.vlgmr.msra.gmra.mxu1 %v2818_v8 }
 0x43a   :  { %1027 = vmatpush1.msra.mxu0 %v2823_v9  ;;  %2008 = vmatpush3.msra.mxu1 %v2377_v14  ;;  %v2843_v14 = vld [vmem:[#allocation5 + $0x140] sm:$0xff] }
 0x43b   :  { %1028 = vmatprep.subr.mxu0 %v2827_v10  ;;  %2009 = vmatprep.subr.mxu1 %v3225_v0 }
 0x43c   :  { %1029 = vmatpush1.msra.mxu0 %v2831_v55  ;;  %2010 = vmatpush3.msra.mxu1 %v2383_v16  ;;  %v2851_v16 = vld [vmem:[#allocation5 + $0x128] sm:$0xff] }
 0x43d   :  { %1030 = vmatprep.subr.mxu0 %v2835_v11  ;;  %2011 = vmatprep.subr.mxu1 %v3225_v0 }
 0x43e   :  { %1031 = vmatpush1.msra.mxu0 %v2839_v13  ;;  %2012 = vmatpush3.msra.mxu1 %v2389_v18  ;;  %v2859_v18 = vld [vmem:[#allocation5 + $0x110] sm:$0xff] }
 0x43f   :  { %1032 = vmatprep.subr.mxu0 %v2843_v14  ;;  %2013 = vmatprep.subr.mxu1 %v3225_v0 }
 0x440   :  { %1033 = vmatpush1.msra.mxu0 %v2847_v15  ;;  %2014 = vmatpush3.msra.mxu1 %v2399_v21  ;;  %v2867_v21 = vld [vmem:[#allocation5 + $0xf8] sm:$0xff] }
 0x441   :  { %1034 = vmatprep.subr.mxu0 %v2851_v16  ;;  %2015 = vmatprep.subr.mxu1 %v3225_v0 }
 0x442   :  { %1035 = vmatpush1.msra.mxu0 %v2855_v17  ;;  %2016 = vmatpush3.msra.mxu1 %v2409_v24  ;;  %v2875_v24 = vld [vmem:[#allocation5 + $0xe0] sm:$0xff] }
 0x443   :  { %1036 = vmatprep.subr.mxu0 %v2859_v18  ;;  %2017 = vmatprep.subr.mxu1 %v3225_v0 }
 0x444   :  { %1037 = vmatpush1.msra.mxu0 %v2863_v63  ;;  %2018 = vmatpush3.msra.mxu1 %v2419_v27 }
 0x445   :  { %1038 = vmatprep.subr.mxu0 %v2867_v21  ;;  %2019 = vmatprep.subr.mxu1 %v3225_v0 }
 0x446   :  { %1039 = vmatpush1.msra.mxu0 %v2871_v38  ;;  %2020 = vmatpush3.msra.mxu1 %v2429_v30 }
 0x447   :  { %1040 = vmatprep.subr.mxu0 %v2875_v24  ;;  %2021 = vmatprep.subr.mxu1 %v3225_v0 }
 0x448   :  { %1041 = vmatpush1.msra.mxu0 %v2392_v19  ;;  %2022 = vmatpush3.msra.mxu1 %v2439_v33  ;;  %v2916_v19 = vld [vmem:[#allocation5 + $0x188] sm:$0xff] }
 0x449   :  { %1042 = vmatprep.subr.mxu0 %v2396_v20  ;;  %2023 = vmatprep.subr.mxu1 %v3225_v0  ;;  %v838_v20 = vstv %s1671_s21 }
 0x44a   :  { %1043 = vmatpush1.msra.mxu0 %v2402_v22  ;;  %2024 = vmatpush3.msra.mxu1 %v2449_v36 }
 0x44b   :  { %1044 = vmatprep.subr.mxu0 %v2406_v23  ;;  %2025 = vmatprep.subr.mxu1 %v3225_v0 }
 0x44c   :  { %1045 = vmatpush1.msra.mxu0 %v2412_v25  ;;  %2026 = vmatpush3.msra.mxu1 %v2459_v39  ;;  %v839_v25 = vmul.f32 %v838_v20, %v3246_v12  ;;  %v3013_v20 = vld [vmem:[#allocation5 + $0x78] sm:$0xff] }
 0x44d   :  { %1046 = vmatprep.subr.mxu0 %v2416_v26  ;;  %2027 = vmatprep.subr.mxu1 %v3225_v0 }
 0x44e   :  { %1047 = vmatpush1.msra.mxu0 %v2422_v28  ;;  %2028 = vmatpush3.msra.mxu1 %v2469_v42 }
 0x44f   :  { %1048 = vmatprep.subr.mxu0 %v2426_v29  ;;  %2029 = vmatprep.subr.mxu1 %v3225_v0  ;;  %v840_v29 = vadd.f32 %v839_v25, %v3229_v60  ;;  %v3023_v25 = vld [vmem:[#allocation5 + $0x60] sm:$0xff] }
 0x450   :  { %1049 = vmatpush1.msra.mxu0 %v2432_v31  ;;  %2030 = vmatpush3.msra.mxu1 %v2477_v44 }
 0x451   :  { %1050 = vmatprep.subr.mxu0 %v2436_v32  ;;  %2031 = vmatprep.subr.mxu1 %v3225_v0 }
 0x452   :  { %1051 = vmatpush1.msra.mxu0 %v2442_v34  ;;  %2032 = vmatpush3.msra.mxu1 %v2483_v45 }
 0x453   :  { %1052 = vmatprep.subr.mxu0 %v2446_v35  ;;  %2033 = vmatprep.subr.mxu1 %v3225_v0 }
 0x454   :  { %1053 = vmatpush1.msra.mxu0 %v2452_v37  ;;  %2034 = vmatpush3.msra.mxu1 %v2488_v46  ;;  %v1010_v37 = vrot.slane %v840_v29, 2 }
 0x455   :  { %1054 = vmatprep.subr.mxu0 %v3239_v2  ;;  %2035 = vmatprep.subr.mxu1 %v3225_v0 }
 0x456   :  { %1055 = vmatpush1.msra.mxu0 %v3240_v3  ;;  %2036 = vmatpush3.msra.mxu1 %v3241_v4 }
 0x457   :  { %1056 = vmatprep.subr.mxu0 %v3242_v5  ;;  %2037 = vmatprep.subr.mxu1 %v3225_v0 }
 0x458   :  { %1057 = vmatpush1.msra.mxu0 %v3243_v6  ;;  %1090 = vmatprep.mubr.f32.mxu0 %v3225_v0  ;;  %v2932_v6 = vld [vmem:[#allocation5 + $0x190] sm:$0xff] }
 0x459   :  { %2038 = vmatpush3.msra.mxu1 %v3244_v7  ;;  %2039 = vmatprep.mubr.msk.f32.mxu1 %vm2313_vm0, %v3225_v0  ;;  %v2938_v7 = vld [vmem:[#allocation5 + $0x178] sm:$0xff] }
 0x45a   :  { %1211 = vmatprep.subr.mxu0 %v2916_v19  ;;  %2042 = vmatprep.subr.mxu1 %v3225_v0 }
 0x4f9   :  { %v907_v22 = vpop.f32.mrf.mxu0  ;;  %v978_v23 = vpop.f32.mrf.mxu1 }
 0x4fa   :  { %v1007_v36 = vadd.f32 %v978_v23, %v2581_v52  ;;  %v3019_v23 = vld [vmem:[#allocation5 + $0x68] sm:$0xff] }
 0x4fb   :  { %v909_v26 = vpop.f32.mrf.mxu0  ;;  %v2006_v27 = vpop.f32.mrf.mxu1 }
 0x4fc   :  { %v984_v28 = vcombine.low %v907_v22, %v909_v26  ;;  %v3016_v22 = vld [vmem:[#allocation5 + $0x88] sm:$0xff]  ;;  %v3026_v26 = vld [vmem:[#allocation5 + $0x70] sm:$0xff] }
 0x4fd   :  { %v3029_v27 = vld [vmem:[#allocation5 + $0x50] sm:$0xff] }
 0x4fe   :  { %v991_v30 = vrot.slane %v984_v28, %v3230_v61  ;;  %v3033_v28 = vld [vmem:[#allocation5 + $0x48] sm:$0xff] }
 0x500   :  { %v998_v31 = vrot.slane %v991_v30, %v3230_v61  ;;  %v3039_v30 = vld [vmem:[#allocation5 + $0x38] sm:$0xff] }
 0x501   :  { %3247 = vst [vmem:[#allocation21_spill] sm:$0xff] %v3039_v30 }
 0x502   :  { %v1000_v32 = vadd.f32 %v998_v31, %v840_v29  ;;  %v3036_v29 = vld [vmem:[#allocation5 + $0x58] sm:$0xff]  ;;  %v3043_v31 = vld [vmem:[#allocation5 + $0x30] sm:$0xff] }
 0x503   :  { %3248 = vst [vmem:[#allocation20_spill] sm:$0xff] %v3043_v31 }
 0x504   :  { %v1672_v33 = vmul.f32 -1.442695, %v1000_v32  ;;  %v3046_v32 = vld [vmem:[#allocation5 + $0x40] sm:$0xff] }
 0x505   :  { %3249 = vst [vmem:[#allocation13_spill] sm:$0xff] %v3046_v32 }
 0x506   :  { %2179 = vpow2.f32 %v1672_v33  ;;  %v3049_v33 = vld [vmem:[#allocation5 + $0x20] sm:$0xff] }
 0x507   :  { %3250 = vst [vmem:[#allocation14_spill] sm:$0xff] %v3049_v33 }
 0x513   :  { %v2180_v34 = vpop.eup %2179 }
 0x514   :  { %v1004_v35 = vadd.f32 1.0, %v2180_v34  ;;  %v3053_v34 = vld [vmem:[#allocation5 + $0x18] sm:$0xff] }
 0x515   :  { %3251 = vst [vmem:[#allocation17_spill] sm:$0xff] %v3053_v34 }
 0x516   :  { %2181 = vrcp.f32 %v1004_v35  ;;  %v3057_v35 = vld [vmem:[#allocation5 + $0x28] sm:$0xff] }
 0x517   :  { %3252 = vst [vmem:[#allocation15_spill] sm:$0xff] %v3057_v35 }
 0x523   :  { %v2182_v39 = vpop.eup %2181 }
 0x524   :  { %v1008_v42 = vmul.f32 %v2182_v39, %v1007_v36  ;;  %v1015_v45 = vrot.slane %v2182_v39, 1  ;;  %v1023_v36 = vstv %s1673_s22 }
 0x526   :  { %v1012_v44 = vadd.f32 %v1010_v37, %v1008_v42  ;;  %v1017_v46 = vsub.f32 1.0, %v1015_v45  ;;  %v1019_v4 = vmul.f32 %v1015_v45, %v2818_v8  ;;  %v3009_v8 = vld [vmem:[#allocation5 + $0x80] sm:$0xff]  ;;  %v1024_v42 = vmul.f32 %v1023_v36, %v3246_v12 }
 0x528   :  { %2183 = vtanh.f32 %v1012_v44 }
 0x535   :  { %v2184_v2 = vpop.eup %2183 }
 0x536   :  { %v1018_v3 = vmul.f32 %v2184_v2, %v1017_v46  ;;  %v1025_v2 = vadd.f32 %v1024_v42, %v3229_v60 }
 0x538   :  { %v2926_v5 = vadd.f32 %v1019_v4, %v1018_v3 }
 0x53a   :  { %1021 = vst [vmem:[#allocation2 + $0x4] sm:$0x1] %v2926_v5  ;;  %1091 = vmatmul.mubr.f32.vlgmr.msra.gmra.mxu0 %v2926_v5  ;;  %2040 = vmatmul.mubr.f32.vlgmr.msra.gmra.mxu1 %v2926_v5 }
 0x53b   :  { %1212 = vmatpush1.msra.mxu0 %v2823_v9  ;;  %2043 = vmatpush3.msra.mxu1 %v2932_v6 }
 0x53c   :  { %1213 = vmatprep.subr.mxu0 %v2827_v10  ;;  %2044 = vmatprep.subr.mxu1 %v3225_v0 }
 0x53d   :  { %1214 = vmatpush1.msra.mxu0 %v2831_v55  ;;  %2045 = vmatpush3.msra.mxu1 %v2938_v7 }
 0x53e   :  { %1215 = vmatprep.subr.mxu0 %v2835_v11  ;;  %2046 = vmatprep.subr.mxu1 %v3225_v0 }
 0x53f   :  { %1216 = vmatpush1.msra.mxu0 %v2839_v13  ;;  %2047 = vmatpush3.msra.mxu1 %v2944_v40 }
 0x540   :  { %1217 = vmatprep.subr.mxu0 %v2843_v14  ;;  %2048 = vmatprep.subr.mxu1 %v3225_v0 }
 0x541   :  { %1218 = vmatpush1.msra.mxu0 %v2847_v15  ;;  %2049 = vmatpush3.msra.mxu1 %v2950_v41 }
 0x542   :  { %1219 = vmatprep.subr.mxu0 %v2851_v16  ;;  %2050 = vmatprep.subr.mxu1 %v3225_v0 }
 0x543   :  { %1220 = vmatpush1.msra.mxu0 %v2855_v17  ;;  %2051 = vmatpush3.msra.mxu1 %v2956_v47 }
 0x544   :  { %1221 = vmatprep.subr.mxu0 %v2859_v18  ;;  %2052 = vmatprep.subr.mxu1 %v3225_v0 }
 0x545   :  { %1222 = vmatpush1.msra.mxu0 %v2863_v63  ;;  %2053 = vmatpush3.msra.mxu1 %v2962_v54 }
 0x546   :  { %1223 = vmatprep.subr.mxu0 %v2867_v21  ;;  %2054 = vmatprep.subr.mxu1 %v3225_v0 }
 0x547   :  { %1224 = vmatpush1.msra.mxu0 %v2871_v38  ;;  %2055 = vmatpush3.msra.mxu1 %v2968_v50 }
 0x548   :  { %1225 = vmatprep.subr.mxu0 %v2875_v24  ;;  %2056 = vmatprep.subr.mxu1 %v3225_v0 }
 0x549   :  { %1226 = vmatpush1.msra.mxu0 %v2973_v1  ;;  %2057 = vmatpush3.msra.mxu1 %v2976_v62 }
 0x54a   :  { %1227 = vmatprep.subr.mxu0 %v2979_v57  ;;  %2058 = vmatprep.subr.mxu1 %v3225_v0 }
 0x54b   :  { %1228 = vmatpush1.msra.mxu0 %v2983_v51  ;;  %2059 = vmatpush3.msra.mxu1 %v2986_v56 }
 0x54c   :  { %1229 = vmatprep.subr.mxu0 %v2989_v43  ;;  %2060 = vmatprep.subr.mxu1 %v3225_v0 }
 0x54d   :  { %1230 = vmatpush1.msra.mxu0 %v2993_v48  ;;  %2061 = vmatpush3.msra.mxu1 %v2996_v58 }
 0x54e   :  { %1231 = vmatprep.subr.mxu0 %v2999_v49  ;;  %2062 = vmatprep.subr.mxu1 %v3225_v0 }
 0x54f   :  { %1232 = vmatpush1.msra.mxu0 %v3003_v59  ;;  %2063 = vmatpush3.msra.mxu1 %v3006_v53 }
 0x550   :  { %1233 = vmatprep.subr.mxu0 %v3009_v8  ;;  %2064 = vmatprep.subr.mxu1 %v3225_v0 }
 0x551   :  { %1234 = vmatpush1.msra.mxu0 %v3013_v20  ;;  %2065 = vmatpush3.msra.mxu1 %v3016_v22 }
 0x552   :  { %1235 = vmatprep.subr.mxu0 %v3019_v23  ;;  %2066 = vmatprep.subr.mxu1 %v3225_v0 }
 0x553   :  { %1236 = vmatpush1.msra.mxu0 %v3023_v25  ;;  %2067 = vmatpush3.msra.mxu1 %v3026_v26 }
 0x554   :  { %1237 = vmatprep.subr.mxu0 %v3029_v27  ;;  %2068 = vmatprep.subr.mxu1 %v3225_v0 }
 0x555   :  { %1238 = vmatpush1.msra.mxu0 %v3033_v28  ;;  %2069 = vmatpush3.msra.mxu1 %v3036_v29 }
 0x556   :  { %1239 = vmatprep.subr.mxu0 %v3039_v30  ;;  %2070 = vmatprep.subr.mxu1 %v3225_v0 }
 0x557   :  { %1240 = vmatpush1.msra.mxu0 %v3043_v31  ;;  %2071 = vmatpush3.msra.mxu1 %v3046_v32  ;;  %v1195_v31 = vrot.slane %v1025_v2, 2 }
 0x558   :  { %1241 = vmatprep.subr.mxu0 %v3049_v33  ;;  %2072 = vmatprep.subr.mxu1 %v3225_v0 }
 0x559   :  { %1242 = vmatpush1.msra.mxu0 %v3053_v34  ;;  %1275 = vmatprep.mubr.f32.mxu0 %v3225_v0 }
 0x55a   :  { %2073 = vmatpush3.msra.mxu1 %v3057_v35  ;;  %2074 = vmatprep.mubr.msk.f32.mxu1 %vm2313_vm0, %v3225_v0 }
 0x55b   :  { %1396 = vmatprep.subr.mxu0 %v2916_v19  ;;  %2077 = vmatprep.subr.mxu1 %v3225_v0 }
 0x5fa   :  { %v1092_v37 = vpop.f32.mrf.mxu0  ;;  %v1163_v39 = vpop.f32.mrf.mxu1 }
 0x5fb   :  { %v1192_v32 = vadd.f32 %v1163_v39, %v2581_v52  ;;  %v3253_v52 = vld [vmem:[#allocation21_spill] sm:$0xff]  ;;  %v81_v39 = vld [vmem:[#allocation5 + $0x198] sm:$0xff] }
 0x5fc   :  { %v1094_v44 = vpop.f32.mrf.mxu0  ;;  %v2041_v45 = vpop.f32.mrf.mxu1 }
 0x5fd   :  { %v1169_v46 = vcombine.low %v1092_v37, %v1094_v44 }
 0x5ff   :  { %v1176_v3 = vrot.slane %v1169_v46, %v3230_v61 }
 0x601   :  { %v1183_v4 = vrot.slane %v1176_v3, %v3230_v61 }
 0x603   :  { %v1185_v35 = vadd.f32 %v1183_v4, %v1025_v2  ;;  %v1393_v2 = vstv %s1677_s24 }
 0x605   :  { %v1674_v34 = vmul.f32 -1.442695, %v1185_v35  ;;  %v82_v35 = vld [vmem:[#allocation5 + $0x1b0] sm:$0xff] }
 0x607   :  { %2185 = vpow2.f32 %v1674_v34  ;;  %v83_v34 = vld [vmem:[#allocation5 + $0x1c8] sm:$0xff] }
 0x614   :  { %v2186_v19 = vpop.eup %2185 }
 0x615   :  { %v1189_v33 = vadd.f32 1.0, %v2186_v19 }
 0x617   :  { %2187 = vrcp.f32 %v1189_v33  ;;  %v84_v33 = vld [vmem:[#allocation5 + $0x1e0] sm:$0xff] }
 0x624   :  { %v2188_v30 = vpop.eup %2187 }
 0x625   :  { %v1193_v12 = vmul.f32 %v2188_v30, %v1192_v32  ;;  %v1200_v37 = vrot.slane %v2188_v30, 1  ;;  %v87_v30 = vld [vmem:[#allocation5 + $0x228] sm:$0xff]  ;;  %v85_v32 = vld [vmem:[#allocation5 + $0x1f8] sm:$0xff] }
 0x627   :  { %v1197_v36 = vadd.f32 %v1195_v31, %v1193_v12  ;;  %v1202_v44 = vsub.f32 1.0, %v1200_v37  ;;  %v1204_v45 = vmul.f32 %v1200_v37, %v2926_v5  ;;  %v86_v31 = vld [vmem:[#allocation5 + $0x210] sm:$0xff] }
 0x629   :  { %2189 = vtanh.f32 %v1197_v36 }
 0x636   :  { %v2190_v60 = vpop.eup %2189 }
 0x637   :  { %v1203_v42 = vmul.f32 %v2190_v60, %v1202_v44 }
 0x639   :  { %v3070_v46 = vadd.f32 %v1204_v45, %v1203_v42 }
 0x63b   :  { %1206 = vst [vmem:[#allocation2 + $0x5] sm:$0x1] %v3070_v46  ;;  %1276 = vmatmul.mubr.f32.vlgmr.msra.gmra.mxu0 %v3070_v46  ;;  %2075 = vmatmul.mubr.f32.vlgmr.msra.gmra.mxu1 %v3070_v46 }
 0x63c   :  { %1397 = vmatpush1.msra.mxu0 %v2823_v9  ;;  %2078 = vmatpush3.msra.mxu1 %v2932_v6  ;;  %v3254_v9 = vld [vmem:[#allocation20_spill] sm:$0xff] }
 0x63d   :  { %1398 = vmatprep.subr.mxu0 %v2827_v10  ;;  %2079 = vmatprep.subr.mxu1 %v3225_v0  ;;  %v3255_v10 = vld [vmem:[#allocation13_spill] sm:$0xff] }
 0x63e   :  { %1399 = vmatpush1.msra.mxu0 %v2831_v55  ;;  %2080 = vmatpush3.msra.mxu1 %v2938_v7  ;;  %v3256_v55 = vld [vmem:[#allocation14_spill] sm:$0xff] }
 0x63f   :  { %1400 = vmatprep.subr.mxu0 %v2835_v11  ;;  %2081 = vmatprep.subr.mxu1 %v3225_v0  ;;  %v3257_v11 = vld [vmem:[#allocation17_spill] sm:$0xff] }
 0x640   :  { %1401 = vmatpush1.msra.mxu0 %v2839_v13  ;;  %2082 = vmatpush3.msra.mxu1 %v2944_v40  ;;  %v3258_v13 = vld [vmem:[#allocation15_spill] sm:$0xff] }
 0x641   :  { %1402 = vmatprep.subr.mxu0 %v2843_v14  ;;  %2083 = vmatprep.subr.mxu1 %v3225_v0  ;;  %v1208_v14 = vstv %s1675_s23 }
 0x642   :  { %1403 = vmatpush1.msra.mxu0 %v2847_v15  ;;  %2084 = vmatpush3.msra.mxu1 %v2950_v41 }
 0x643   :  { %1404 = vmatprep.subr.mxu0 %v2851_v16  ;;  %2085 = vmatprep.subr.mxu1 %v3225_v0 }
 0x644   :  { %1405 = vmatpush1.msra.mxu0 %v2855_v17  ;;  %2086 = vmatpush3.msra.mxu1 %v2956_v47  ;;  %v3141_v17 = vld [vmem:[#allocation5] ss:$8 sm:$0x7] }
 0x645   :  { %1406 = vmatprep.subr.mxu0 %v2859_v18  ;;  %2087 = vmatprep.subr.mxu1 %v3225_v0  ;;  %v1209_v18 = vmul.f32 %v3141_v17, %v1208_v14  ;;  %v1394_v19 = vmul.f32 %v3141_v17, %v1393_v2 }
 0x646   :  { %1407 = vmatpush1.msra.mxu0 %v2863_v63  ;;  %2088 = vmatpush3.msra.mxu1 %v2962_v54 }
 0x647   :  { %1408 = vmatprep.subr.mxu0 %v2867_v21  ;;  %2089 = vmatprep.subr.mxu1 %v3225_v0 }
 0x648   :  { %1409 = vmatpush1.msra.mxu0 %v2871_v38  ;;  %2090 = vmatpush3.msra.mxu1 %v2968_v50  ;;  %v3149_v50 = vld [vmem:[#allocation5 + $0x12] ss:$0 sm:$0xff] }
 0x649   :  { %1410 = vmatprep.subr.mxu0 %v2875_v24  ;;  %2091 = vmatprep.subr.mxu1 %v3225_v0  ;;  %v3144_v24 = vld [vmem:[#allocation5 + $0x1] ss:$8 sm:$0x7] }
 0x64a   :  { %1411 = vmatpush1.msra.mxu0 %v2973_v1  ;;  %2092 = vmatpush3.msra.mxu1 %v2976_v62  ;;  %v1210_v5 = vadd.f32 %v3144_v24, %v1209_v18  ;;  %v1395_v44 = vadd.f32 %v3144_v24, %v1394_v19 }
 0x64b   :  { %1412 = vmatprep.subr.mxu0 %v2979_v57  ;;  %2093 = vmatprep.subr.mxu1 %v3225_v0 }
 0x64c   :  { %1413 = vmatpush1.msra.mxu0 %v2983_v51  ;;  %2094 = vmatpush3.msra.mxu1 %v2986_v56  ;;  %v1380_v62 = vrot.slane %v1210_v5, 2 }
 0x64d   :  { %1414 = vmatprep.subr.mxu0 %v2989_v43  ;;  %2095 = vmatprep.subr.mxu1 %v3225_v0 }
 0x64e   :  { %1415 = vmatpush1.msra.mxu0 %v2993_v48  ;;  %2096 = vmatpush3.msra.mxu1 %v2996_v58 }
 0x64f   :  { %1416 = vmatprep.subr.mxu0 %v2999_v49  ;;  %2097 = vmatprep.subr.mxu1 %v3225_v0 }
 0x650   :  { %1417 = vmatpush1.msra.mxu0 %v3003_v59  ;;  %2098 = vmatpush3.msra.mxu1 %v3006_v53 }
 0x651   :  { %1418 = vmatprep.subr.mxu0 %v3009_v8  ;;  %2099 = vmatprep.subr.mxu1 %v3225_v0  ;;  %v96_v8 = vld [vmem:[#allocation5 + $0x300] sm:$0xff] }
 0x652   :  { %1419 = vmatpush1.msra.mxu0 %v3013_v20  ;;  %2100 = vmatpush3.msra.mxu1 %v3016_v22  ;;  %v95_v20 = vld [vmem:[#allocation5 + $0x2e8] sm:$0xff]  ;;  %v94_v22 = vld [vmem:[#allocation5 + $0x2d0] sm:$0xff] }
 0x653   :  { %1420 = vmatprep.subr.mxu0 %v3019_v23  ;;  %2101 = vmatprep.subr.mxu1 %v3225_v0  ;;  %v93_v23 = vld [vmem:[#allocation5 + $0x2b8] sm:$0xff] }
 0x654   :  { %1421 = vmatpush1.msra.mxu0 %v3023_v25  ;;  %2102 = vmatpush3.msra.mxu1 %v3026_v26  ;;  %v92_v25 = vld [vmem:[#allocation5 + $0x2a0] sm:$0xff]  ;;  %v91_v26 = vld [vmem:[#allocation5 + $0x288] sm:$0xff] }
 0x655   :  { %1422 = vmatprep.subr.mxu0 %v3029_v27  ;;  %2103 = vmatprep.subr.mxu1 %v3225_v0  ;;  %v90_v27 = vld [vmem:[#allocation5 + $0x270] sm:$0xff] }
 0x656   :  { %1423 = vmatpush1.msra.mxu0 %v3033_v28  ;;  %2104 = vmatpush3.msra.mxu1 %v3036_v29  ;;  %v89_v28 = vld [vmem:[#allocation5 + $0x258] sm:$0xff]  ;;  %v88_v29 = vld [vmem:[#allocation5 + $0x240] sm:$0xff] }
 0x657   :  { %1424 = vmatprep.subr.mxu0 %v3253_v52  ;;  %2105 = vmatprep.subr.mxu1 %v3225_v0 }
 0x658   :  { %1425 = vmatpush1.msra.mxu0 %v3254_v9  ;;  %2106 = vmatpush3.msra.mxu1 %v3255_v10  ;;  %v1565_v10 = vrot.slane %v1395_v44, 2 }
 0x659   :  { %1426 = vmatprep.subr.mxu0 %v3256_v55  ;;  %2107 = vmatprep.subr.mxu1 %v3225_v0 }
 0x65a   :  { %1427 = vmatpush1.msra.mxu0 %v3257_v11  ;;  %1460 = vmatprep.mubr.f32.mxu0 %v3225_v0 }
 0x65b   :  { %2108 = vmatpush3.msra.mxu1 %v3258_v13  ;;  %2109 = vmatprep.mubr.msk.f32.mxu1 %vm2313_vm0, %v3225_v0 }
 0x65c   :  { %2112 = vmatprep.subr.mxu0 %v3225_v0 }
 0x6fb   :  { %v1277_v15 = vpop.f32.mrf.mxu0  ;;  %v1348_v16 = vpop.f32.mrf.mxu1 }
 0x6fc   :  { %v1377_v1 = vadd.f32 %v3149_v50, %v1348_v16 }
 0x6fd   :  { %v1279_v63 = vpop.f32.mrf.mxu0  ;;  %v2076_v21 = vpop.f32.mrf.mxu1 }
 0x6fe   :  { %v1354_v38 = vcombine.low %v1277_v15, %v1279_v63  ;;  %v32_v21 = vld [vmem:[#allocation5 + $0x3] ss:$0 sm:$0xff] }
 0x700   :  { %v1361_v6 = vrot.slane %v1354_v38, %v3230_v61 }
 0x702   :  { %v1368_v7 = vrot.slane %v1361_v6, %v3230_v61 }
 0x704   :  { %v1370_v40 = vadd.f32 %v1368_v7, %v1210_v5 }
 0x706   :  { %v1676_v41 = vmul.f32 -1.442695, %v1370_v40 }
 0x708   :  { %2191 = vpow2.f32 %v1676_v41 }
 0x715   :  { %v2192_v47 = vpop.eup %2191 }
 0x716   :  { %v1374_v54 = vadd.f32 1.0, %v2192_v47 }
 0x718   :  { %2193 = vrcp.f32 %v1374_v54 }
 0x725   :  { %v2194_v57 = vpop.eup %2193 }
 0x726   :  { %v1378_v51 = vmul.f32 %v2194_v57, %v1377_v1  ;;  %v1385_v43 = vrot.slane %v2194_v57, 1 }
 0x728   :  { %v1382_v56 = vadd.f32 %v1380_v62, %v1378_v51  ;;  %v1387_v48 = vsub.f32 1.0, %v1385_v43  ;;  %v1389_v59 = vmul.f32 %v1385_v43, %v3070_v46 }
 0x72a   :  { %2195 = vtanh.f32 %v1382_v56 }
 0x737   :  { %v2196_v58 = vpop.eup %2195 }
 0x738   :  { %v1388_v49 = vmul.f32 %v2196_v58, %v1387_v48 }
 0x73a   :  { %v3153_v53 = vadd.f32 %v1389_v59, %v1388_v49 }
 0x73c   :  { %1391 = vst [vmem:[#allocation2 + $0x6] sm:$0x1] %v3153_v53  ;;  %1461 = vmatmul.mubr.f32.vlgmr.msra.gmra.mxu0 %v3153_v53  ;;  %2110 = vmatmul.mubr.f32.vlgmr.msra.gmra.mxu1 %v3153_v53 }
 0x73d   :  { %2144 = vmatprep.mubr.msk.f32.mxu0 %vm2313_vm0, %v3225_v0  ;;  %2113 = vmatpush3.msra.mxu0 %v96_v8 }
 0x73e   :  { %2114 = vmatprep.subr.mxu0 %v3225_v0 }
 0x73f   :  { %2115 = vmatpush3.msra.mxu0 %v95_v20 }
 0x740   :  { %2116 = vmatprep.subr.mxu0 %v3225_v0 }
 0x741   :  { %2117 = vmatpush3.msra.mxu0 %v94_v22 }
 0x742   :  { %2118 = vmatprep.subr.mxu0 %v3225_v0 }
 0x743   :  { %2119 = vmatpush3.msra.mxu0 %v93_v23 }
 0x744   :  { %2120 = vmatprep.subr.mxu0 %v3225_v0 }
 0x745   :  { %2121 = vmatpush3.msra.mxu0 %v92_v25 }
 0x746   :  { %2122 = vmatprep.subr.mxu0 %v3225_v0 }
 0x747   :  { %2123 = vmatpush3.msra.mxu0 %v91_v26 }
 0x748   :  { %2124 = vmatprep.subr.mxu0 %v3225_v0 }
 0x749   :  { %2125 = vmatpush3.msra.mxu0 %v90_v27 }
 0x74a   :  { %2126 = vmatprep.subr.mxu0 %v3225_v0 }
 0x74b   :  { %2127 = vmatpush3.msra.mxu0 %v89_v28 }
 0x74c   :  { %2128 = vmatprep.subr.mxu0 %v3225_v0 }
 0x74d   :  { %2129 = vmatpush3.msra.mxu0 %v88_v29 }
 0x74e   :  { %2130 = vmatprep.subr.mxu0 %v3225_v0 }
 0x74f   :  { %2131 = vmatpush3.msra.mxu0 %v87_v30 }
 0x750   :  { %2132 = vmatprep.subr.mxu0 %v3225_v0 }
 0x751   :  { %2133 = vmatpush3.msra.mxu0 %v86_v31 }
 0x752   :  { %2134 = vmatprep.subr.mxu0 %v3225_v0 }
 0x753   :  { %2135 = vmatpush3.msra.mxu0 %v85_v32 }
 0x754   :  { %2136 = vmatprep.subr.mxu0 %v3225_v0 }
 0x755   :  { %2137 = vmatpush3.msra.mxu0 %v84_v33 }
 0x756   :  { %2138 = vmatprep.subr.mxu0 %v3225_v0 }
 0x757   :  { %2139 = vmatpush3.msra.mxu0 %v83_v34 }
 0x758   :  { %2140 = vmatprep.subr.mxu0 %v3225_v0 }
 0x759   :  { %2141 = vmatpush3.msra.mxu0 %v82_v35 }
 0x75a   :  { %2142 = vmatprep.subr.mxu0 %v3225_v0 }
 0x75b   :  { %2143 = vmatpush3.msra.mxu0 %v81_v39 }
 0x7fc   :  { %v1462_v3 = vpop.f32.mrf.mxu0  ;;  %v1533_v4 = vpop.f32.mrf.mxu1 }
 0x7fd   :  { %v1562_v9 = vadd.f32 %v3149_v50, %v1533_v4 }
 0x7fe   :  { %v1464_v12 = vpop.f32.mrf.mxu0  ;;  %v2111_v36 = vpop.f32.mrf.mxu1 }
 0x7ff   :  { %v1539_v37 = vcombine.low %v1462_v3, %v1464_v12 }
 0x801   :  { %v1546_v60 = vrot.slane %v1539_v37, %v3230_v61 }
 0x803   :  { %v1553_v42 = vrot.slane %v1546_v60, %v3230_v61 }
 0x805   :  { %v1555_v45 = vadd.f32 %v1553_v42, %v1395_v44 }
 0x807   :  { %v1678_v46 = vmul.f32 -1.442695, %v1555_v45 }
 0x809   :  { %2197 = vpow2.f32 %v1678_v46 }
 0x816   :  { %v2198_v0 = vpop.eup %2197 }
 0x817   :  { %v1559_v52 = vadd.f32 1.0, %v2198_v0 }
 0x819   :  { %2199 = vrcp.f32 %v1559_v52 }
 0x826   :  { %v2200_v55 = vpop.eup %2199 }
 0x827   :  { %v1563_v11 = vmul.f32 %v2200_v55, %v1562_v9  ;;  %v1570_v14 = vrot.slane %v2200_v55, 1 }
 0x829   :  { %v1567_v13 = vadd.f32 %v1565_v10, %v1563_v11  ;;  %v1572_v15 = vsub.f32 1.0, %v1570_v14  ;;  %v1574_v18 = vmul.f32 %v1570_v14, %v3153_v53 }
 0x82b   :  { %2201 = vtanh.f32 %v1567_v13 }
 0x838   :  { %v2202_v16 = vpop.eup %2201 }
 0x839   :  { %v1573_v17 = vmul.f32 %v2202_v16, %v1572_v15 }
 0x83b   :  { %v1575_v61 = vadd.f32 %v1574_v18, %v1573_v17 }
 0x83d   :  { %1576 = vst [vmem:[#allocation2 + $0x7] sm:$0x1] %v1575_v61 }
 0x844   :  { %v1577_v63 = vld [vmem:[#allocation2] sm:$0xff] }
 0x845   :  { %2145 = vmatmul.mubr.f32.vlgmr.msra.gmra.mxu0 %v1577_v63 }
 0x905   :  { %v1644_v38 = vpop.f32.mrf.mxu0 }
 0x906   :  { %v1645_v24 = vadd.f32 %v1644_v38, %v32_v21 }
 0x907   :  { %v2146_v5 = vpop.f32.mrf.mxu0 }
 0x908   :  { %1648 = vst [vmem:[#allocation8] sm:$0xff] %v1645_v24 }
 0x909   :  { %2293 = shalt.err (!%p2290_p9)
}
 0x90a   :  { %1658 = dma.vmem_to_hbm [thread:$0]  %s1656_s26, 128, %s3186_s2, [#allocation7]  }
 0x90b   :  { %2306 = dma.done.wait [#allocation7], 128  }
 0x90c   :  { %2307 = vsyncadd [#allocation7], 4294967168 }
 0x90d   :  { %1662 = vsyncpa [#allocation6], 1 }
 0x90e   :  { %1663 = vsyncpa [#allocation7], 1 }

</bundles_post_ra>
